<compile_context>
chip_gen: v6e
topology: v6e:2x2x1
jax: 0.10.0
libtpu: 0.0.40
codegen_flags: <defaults>
</compile_context>

<pallas_src>
import functools

import numpy as np
import jax
import jax.numpy as jnp
from jax.experimental import pallas as pl
from jax.experimental.pallas import tpu as pltpu

# Make the pure-JAX reference and the in-kernel dots use the same (f32-exact)
# matmul algorithm so the parity check below is tight.
jax.config.update("jax_default_matmul_precision", "highest")

C_PAD = 128  # lane-dense padded width of the final FC output


def _round_up(x, m):
    return ((x + m - 1) // m) * m


# ---------------------------------------------------------------------------
# Fused kernel
# ---------------------------------------------------------------------------
def make_fused_kernel(B, S, E, V_pad, max_fs, NF_pad):
    """B here is the per-grid-step batch block."""
    R_WG = max_fs * E            # highway ReLU-gate weight rows
    R_WT = R_WG + NF_pad         # highway transform-gate weight rows
    R_CB = R_WT + NF_pad         # conv bias row
    R_VL = R_CB + 1              # per-lane valid-length row
    R_BG = R_VL + 1              # highway g bias row
    R_BT = R_BG + 1              # highway t bias row
    N_ROWS = B * S

    def kernel(tok_ref, table_ref, wpack_ref, fcpack_ref, o_ref):
        # ---- embedding lookup: one-hot @ table on the MXU (toy vocab) ----
        tok = tok_ref[...]                                            # (B, S) int32
        lane = jax.lax.broadcasted_iota(jnp.int32, (B, S, V_pad), 2)
        onehot = (lane == tok[:, :, None]).astype(jnp.float32)        # (B, S, Vp)
        onehot = onehot.reshape(N_ROWS, V_pad)                        # merge leading dims
        emb = jnp.dot(onehot, table_ref[...],
                      preferred_element_type=jnp.float32)             # (B*S, E)

        # ---- conv banks: merged-tap matmuls + exact shift-matrix accumulate
        # acts[b*S + l, f] = sum_i emb[b, l+i, :] @ Wtap_i[:, f]
        # Taps a bank does not have are zero columns; positions past the
        # bank's valid length are masked before pooling, so any cross-batch
        # wraparound in the shift never reaches the output.
        row_i = jax.lax.broadcasted_iota(jnp.int32, (N_ROWS, N_ROWS), 0)
        col_i = jax.lax.broadcasted_iota(jnp.int32, (N_ROWS, N_ROWS), 1)
        acts = None
        for i in range(max_fs):                                       # static unroll
            w_i = wpack_ref[i * E:(i + 1) * E, :]                     # (E, NF_pad) free view
            proj = jnp.dot(emb, w_i, preferred_element_type=jnp.float32)
            if i > 0:
                # shift[j, k] = 1 iff k == j + i  ->  (shift @ proj)[j] = proj[j+i]
                shift = (col_i == row_i + i).astype(jnp.float32)
                proj = jnp.dot(shift, proj, preferred_element_type=jnp.float32)
            acts = proj if acts is None else acts + proj              # (B*S, NF_pad)

        conv_b = wpack_ref[R_CB:R_CB + 1, :]                          # (1, NF_pad)
        valid_len = wpack_ref[R_VL:R_VL + 1, :].astype(jnp.int32)     # (1, NF_pad)
        acts = jnp.maximum(acts + conv_b, 0.0)
        acts3 = acts.reshape(B, S, NF_pad)                            # split leading dim
        pos = jax.lax.broadcasted_iota(jnp.int32, (B, S, NF_pad), 1)
        masked = jnp.where(pos < valid_len[None, :, :], acts3, 0.0)
        h = jnp.max(masked, axis=1)                                   # (B, NF_pad) pooled

        # ---- highway (num_layers=1, extra gate bias = 0 as in forward()) ----
        wg = wpack_ref[R_WG:R_WG + NF_pad, :]
        wt = wpack_ref[R_WT:R_WT + NF_pad, :]
        bg = wpack_ref[R_BG:R_BG + 1, :]
        bt = wpack_ref[R_BT:R_BT + 1, :]
        g = jnp.maximum(jnp.dot(h, wg, preferred_element_type=jnp.float32) + bg, 0.0)
        t_lin = jnp.dot(h, wt, preferred_element_type=jnp.float32) + bt
        t = 1.0 / (1.0 + jnp.exp(-t_lin))        # exact sigmoid (parity with torch)
        z = t * g + (1.0 - t) * h
        # TODO(synk): dropout is eval-mode identity here; training parity would
        # need pltpu.prng_seed + pltpu.stateful_bernoulli.

        # ---- final FC into the lane-dense padded output slab ----
        wf = fcpack_ref[0:NF_pad, :]                                  # (NF_pad, 128)
        bf = fcpack_ref[NF_pad:NF_pad + 1, :]                         # (1, 128)
        o_ref[...] = jnp.dot(z, wf, preferred_element_type=jnp.float32) + bf

    return kernel


# ---------------------------------------------------------------------------
# Parameters (synthetic, deterministic) -- mirrors the PyTorch module layout.
# Note: the reference module's highway/linear create fresh nn.Linear modules
# every forward(); here we use one fixed set of equivalent learned weights.
# ---------------------------------------------------------------------------
def init_params(key, vocab_size, emb_size, filter_sizes, num_filters,
                num_classes):
    n_keys = 1 + 2 * len(filter_sizes) + 6
    keys = iter(jax.random.split(key, n_keys))
    params = {}
    params["embedding"] = (
        jax.random.normal(next(keys), (vocab_size, emb_size), jnp.float32) * 0.1)
    convs = []
    for fs, nf in zip(filter_sizes, num_filters):
        # PyTorch Conv2d weight shape: (out_channels, 1, fs, emb_size)
        w = jax.random.normal(next(keys), (nf, 1, fs, emb_size), jnp.float32) * 0.1
        b = jax.random.normal(next(keys), (nf,), jnp.float32) * 0.1
        convs.append((w, b))
    params["convs"] = convs
    n_total = sum(num_filters)
    params["hw_g_w"] = jax.random.normal(next(keys), (n_total, n_total), jnp.float32) * 0.1
    params["hw_g_b"] = jax.random.normal(next(keys), (1, n_total), jnp.float32) * 0.1
    params["hw_t_w"] = jax.random.normal(next(keys), (n_total, n_total), jnp.float32) * 0.1
    params["hw_t_b"] = jax.random.normal(next(keys), (1, n_total), jnp.float32) * 0.1
    params["fc_w"] = jax.random.normal(next(keys), (n_total, num_classes), jnp.float32) * 0.1
    params["fc_b"] = jax.random.normal(next(keys), (1, num_classes), jnp.float32) * 0.1
    return params


def pack_params(params, filter_sizes, num_filters, seq_len, num_classes):
    """One-time host-side packing (all per-call weight prep hoisted here)."""
    emb_tbl = np.asarray(params["embedding"], np.float32)       # (V, E)
    V, E = emb_tbl.shape
    NF = sum(num_filters)
    NF_pad = _round_up(NF, 8)
    max_fs = max(filter_sizes)
    V_pad = _round_up(V, 128)

    table = np.zeros((V_pad, E), np.float32)
    table[:V] = emb_tbl

    # Merged tap weights: tap i is a full (E, NF_pad) block; banks without
    # tap i (fs <= i) and pad lanes are zero columns.
    w_taps = np.zeros((max_fs, E, NF_pad), np.float32)
    conv_b = np.zeros((1, NF_pad), np.float32)
    valid_len = np.zeros((1, NF_pad), np.float32)   # pad lanes: 0 -> fully masked
    off = 0
    for (w, b), fs, nf in zip(params["convs"], filter_sizes, num_filters):
        w_np = np.asarray(w, np.float32)                        # (nf, 1, fs, E)
        for i in range(fs):
            w_taps[i, :, off:off + nf] = w_np[:, 0, i, :].T     # (E, nf)
        conv_b[0, off:off + nf] = np.asarray(b, np.float32)
        valid_len[0, off:off + nf] = float(seq_len - fs + 1)
        off += nf

    NFt = NF
    wg = np.zeros((NF_pad, NF_pad), np.float32); wg[:NFt, :NFt] = np.asarray(params["hw_g_w"])
    wt = np.zeros((NF_pad, NF_pad), np.float32); wt[:NFt, :NFt] = np.asarray(params["hw_t_w"])
    bg = np.zeros((1, NF_pad), np.float32); bg[0, :NFt] = np.asarray(params["hw_g_b"])[0]
    bt = np.zeros((1, NF_pad), np.float32); bt[0, :NFt] = np.asarray(params["hw_t_b"])[0]

    # One NF_pad-wide packed buffer: [tap0..tapK | Wg | Wt | conv_b | valid | bg | bt]
    pack_w = np.concatenate([w_taps.reshape(max_fs * E, NF_pad),
                             wg, wt, conv_b, valid_len, bg, bt], axis=0)

    # One 128-wide packed buffer: [Wf (zero-padded cols) ; bf]
    wf = np.zeros((NF_pad, C_PAD), np.float32); wf[:NFt, :num_classes] = np.asarray(params["fc_w"])
    bf = np.zeros((1, C_PAD), np.float32); bf[0, :num_classes] = np.asarray(params["fc_b"])[0]
    pack_fc = np.concatenate([wf, bf], axis=0)

    return {"table": jnp.asarray(table),
            "pack_w": jnp.asarray(pack_w),
            "pack_fc": jnp.asarray(pack_fc)}


# ---------------------------------------------------------------------------
# Forward wrapper: only the pallas_call + one tiny output slice per call.
# ---------------------------------------------------------------------------
def discriminator_forward(packed, tokens, *, filter_sizes, num_filters,
                          num_classes):
    B, S = tokens.shape
    V_pad, E = packed["table"].shape
    NF_pad = packed["pack_w"].shape[1]
    max_fs = max(filter_sizes)

    # Batch grid axis: one step at toy B; shards across v7x's 2 TCs for big B.
    # (Pick b_blk dividing B for the multi-block path.)
    b_blk = B if B <= 8 else 8
    grid = (pl.cdiv(B, b_blk),)

    kernel = make_fused_kernel(b_blk, S, E, V_pad, max_fs, NF_pad)

    flops = (2 * B * S * V_pad * E
             + max_fs * 2 * B * S * E * NF_pad
             + (max_fs - 1) * 2 * (b_blk * S) * (b_blk * S) * NF_pad * grid[0]
             + 2 * 2 * B * NF_pad * NF_pad
             + 2 * B * NF_pad * C_PAD)
    bytes_accessed = (tokens.size * 4 + packed["table"].size * 4
                      + packed["pack_w"].size * 4 + packed["pack_fc"].size * 4
                      + B * C_PAD * 4)
    cost = pl.CostEstimate(flops=int(flops), transcendentals=int(B * NF_pad),
                           bytes_accessed=int(bytes_accessed))

    out = pl.pallas_call(
        kernel,
        out_shape=jax.ShapeDtypeStruct((B, C_PAD), jnp.float32),
        grid=grid,
        in_specs=[
            pl.BlockSpec((b_blk, S), lambda b: (b, 0)),                # tokens
            pl.BlockSpec((V_pad, E), lambda b: (0, 0)),                # emb table
            pl.BlockSpec(packed["pack_w"].shape, lambda b: (0, 0)),    # packed weights
            pl.BlockSpec(packed["pack_fc"].shape, lambda b: (0, 0)),   # packed FC
        ],
        out_specs=pl.BlockSpec((b_blk, C_PAD), lambda b: (b, 0)),
        compiler_params=pltpu.CompilerParams(
            dimension_semantics=("parallel",)),
        cost_estimate=cost,
    )(tokens, packed["table"], packed["pack_w"], packed["pack_fc"])

    return out[:, :num_classes]                                        # (B, num_classes)


# ---------------------------------------------------------------------------
# Pure-JAX reference (mirrors the PyTorch forward) for a parity check.
# ---------------------------------------------------------------------------
def reference_forward(params, tokens, filter_sizes):
    emb = jnp.take(params["embedding"], tokens, axis=0)          # (B, S, E)
    B, S, E = emb.shape
    pooled = []
    for (w, b), fs in zip(params["convs"], filter_sizes):
        nf = w.shape[0]
        wmat = w.reshape(nf, fs * E)                             # (nf, fs*E)
        outs = []
        for l in range(S - fs + 1):
            patch = emb[:, l:l + fs, :].reshape(B, fs * E)
            outs.append(patch @ wmat.T + b[None, :])
        conv = jnp.stack(outs, axis=1)                           # (B, L, nf)
        pooled.append(jnp.max(jax.nn.relu(conv), axis=1))        # (B, nf)
    h = jnp.concatenate(pooled, axis=-1)
    g = jax.nn.relu(h @ params["hw_g_w"] + params["hw_g_b"])
    t = jax.nn.sigmoid(h @ params["hw_t_w"] + params["hw_t_b"])  # highway bias arg = 0
    z = t * g + (1.0 - t) * h
    return z @ params["fc_w"] + params["fc_b"]


if __name__ == "__main__":
    batch, seq_len = 2, 8
    vocab_size, emb_size = 20, 32
    filter_sizes = (2, 3)
    num_filters = (8, 8)
    num_classes = 2

    key = jax.random.PRNGKey(0)
    pkey, xkey = jax.random.split(key)
    params = init_params(pkey, vocab_size, emb_size, filter_sizes,
                         num_filters, num_classes)
    tokens = jax.random.randint(xkey, (batch, seq_len), 0, vocab_size,
                                dtype=jnp.int32)

    packed = pack_params(params, filter_sizes, num_filters, seq_len,
                         num_classes)

    fwd = jax.jit(functools.partial(discriminator_forward,
                                    filter_sizes=filter_sizes,
                                    num_filters=num_filters,
                                    num_classes=num_classes))
    scores = fwd(packed, tokens)
    jax.block_until_ready(scores)
    assert scores.shape == (batch, num_classes)

    ref = reference_forward(params, tokens, filter_sizes)
    np.testing.assert_allclose(np.asarray(scores), np.asarray(ref),
                               rtol=2e-3, atol=2e-3)
    print("KERNEL_OK")
</pallas_src>

<mosaic_0001>
module attributes {stable_mosaic.version = 11 : i64} {
  func.func @kernel(%arg0: i32, %arg1: memref<2x8xi32, #tpu.memory_space<vmem>>, %arg2: memref<128x32xf32, #tpu.memory_space<vmem>>, %arg3: memref<132x16xf32, #tpu.memory_space<vmem>>, %arg4: memref<17x128xf32, #tpu.memory_space<vmem>>, %arg5: memref<2x128xf32, #tpu.memory_space<vmem>>) attributes {dimension_semantics = [#tpu.dimension_semantics<parallel>], iteration_bounds = array<i64: 1>, scalar_prefetch = 0 : i64, scratch_operands = 0 : i64, tpu.core_type = #tpu.core_type<tc>, window_params = [{transform_indices = @transform_0, window_bounds = array<i64: 2, 8>}, {pipeline_mode = #tpu.pipeline_mode<synchronous>, transform_indices = @transform_1, window_bounds = array<i64: 128, 32>}, {pipeline_mode = #tpu.pipeline_mode<synchronous>, transform_indices = @transform_2, window_bounds = array<i64: 132, 16>}, {pipeline_mode = #tpu.pipeline_mode<synchronous>, transform_indices = @transform_3, window_bounds = array<i64: 17, 128>}, {transform_indices = @transform_4, window_bounds = array<i64: 2, 128>}]} {
    %c0 = arith.constant 0 : index
    %c0_0 = arith.constant 0 : index
    %0 = vector.load %arg1[%c0, %c0_0] : memref<2x8xi32, #tpu.memory_space<vmem>>, vector<2x8xi32>
    %1 = tpu.iota {dimensions = array<i32: 2>} : vector<2x8x128xi32>
    %2 = vector.shape_cast %0 : vector<2x8xi32> to vector<2x8x1xi32>
    %3 = vector.broadcast %2 : vector<2x8x1xi32> to vector<2x8x128xi32>
    %4 = arith.cmpi eq, %1, %3 : vector<2x8x128xi32>
    %5 = arith.extui %4 : vector<2x8x128xi1> to vector<2x8x128xi32>
    %6 = arith.sitofp %5 : vector<2x8x128xi32> to vector<2x8x128xf32>
    %7 = vector.shape_cast %6 : vector<2x8x128xf32> to vector<16x128xf32>
    %c0_1 = arith.constant 0 : index
    %c0_2 = arith.constant 0 : index
    %8 = vector.load %arg2[%c0_1, %c0_2] : memref<128x32xf32, #tpu.memory_space<vmem>>, vector<128x32xf32>
    %cst = arith.constant dense<0.000000e+00> : vector<16x32xf32>
    %9 = tpu.matmul %7, %8, %cst {dimension_numbers = #tpu.dot_dimension_numbers<[1], [0], [0], [1], [0, 0, 1, 1], [], []>, precision = #tpu.contract_precision<fp32>} : vector<16x128xf32>, vector<128x32xf32>, vector<16x32xf32> -> vector<16x32xf32>
    %10 = tpu.iota {dimensions = array<i32: 0>} : vector<16x16xi32>
    %11 = tpu.iota {dimensions = array<i32: 1>} : vector<16x16xi32>
    %c0_3 = arith.constant 0 : index
    %c0_4 = arith.constant 0 : index
    %12 = vector.load %arg3[%c0_3, %c0_4] : memref<132x16xf32, #tpu.memory_space<vmem>>, vector<32x16xf32>
    %cst_5 = arith.constant dense<0.000000e+00> : vector<16x16xf32>
    %13 = tpu.matmul %9, %12, %cst_5 {dimension_numbers = #tpu.dot_dimension_numbers<[1], [0], [0], [1], [0, 0, 1, 1], [], []>, precision = #tpu.contract_precision<fp32>} : vector<16x32xf32>, vector<32x16xf32>, vector<16x16xf32> -> vector<16x16xf32>
    %c32 = arith.constant 32 : index
    %c0_6 = arith.constant 0 : index
    %14 = vector.load %arg3[%c32, %c0_6] : memref<132x16xf32, #tpu.memory_space<vmem>>, vector<32x16xf32>
    %cst_7 = arith.constant dense<0.000000e+00> : vector<16x16xf32>
    %15 = tpu.matmul %9, %14, %cst_7 {dimension_numbers = #tpu.dot_dimension_numbers<[1], [0], [0], [1], [0, 0, 1, 1], [], []>, precision = #tpu.contract_precision<fp32>} : vector<16x32xf32>, vector<32x16xf32>, vector<16x16xf32> -> vector<16x16xf32>
    %c1_i32 = arith.constant 1 : i32
    %16 = vector.broadcast %c1_i32 : i32 to vector<16x16xi32>
    %17 = arith.addi %10, %16 : vector<16x16xi32>
    %18 = arith.cmpi eq, %11, %17 : vector<16x16xi32>
    %19 = arith.extui %18 : vector<16x16xi1> to vector<16x16xi32>
    %20 = arith.sitofp %19 : vector<16x16xi32> to vector<16x16xf32>
    %cst_8 = arith.constant dense<0.000000e+00> : vector<16x16xf32>
    %21 = tpu.matmul %20, %15, %cst_8 {dimension_numbers = #tpu.dot_dimension_numbers<[1], [0], [0], [1], [0, 0, 1, 1], [], []>, precision = #tpu.contract_precision<fp32>} : vector<16x16xf32>, vector<16x16xf32>, vector<16x16xf32> -> vector<16x16xf32>
    %22 = arith.addf %13, %21 : vector<16x16xf32>
    %c64 = arith.constant 64 : index
    %c0_9 = arith.constant 0 : index
    %23 = vector.load %arg3[%c64, %c0_9] : memref<132x16xf32, #tpu.memory_space<vmem>>, vector<32x16xf32>
    %cst_10 = arith.constant dense<0.000000e+00> : vector<16x16xf32>
    %24 = tpu.matmul %9, %23, %cst_10 {dimension_numbers = #tpu.dot_dimension_numbers<[1], [0], [0], [1], [0, 0, 1, 1], [], []>, precision = #tpu.contract_precision<fp32>} : vector<16x32xf32>, vector<32x16xf32>, vector<16x16xf32> -> vector<16x16xf32>
    %c2_i32 = arith.constant 2 : i32
    %25 = vector.broadcast %c2_i32 : i32 to vector<16x16xi32>
    %26 = arith.addi %10, %25 : vector<16x16xi32>
    %27 = arith.cmpi eq, %11, %26 : vector<16x16xi32>
    %28 = arith.extui %27 : vector<16x16xi1> to vector<16x16xi32>
    %29 = arith.sitofp %28 : vector<16x16xi32> to vector<16x16xf32>
    %cst_11 = arith.constant dense<0.000000e+00> : vector<16x16xf32>
    %30 = tpu.matmul %29, %24, %cst_11 {dimension_numbers = #tpu.dot_dimension_numbers<[1], [0], [0], [1], [0, 0, 1, 1], [], []>, precision = #tpu.contract_precision<fp32>} : vector<16x16xf32>, vector<16x16xf32>, vector<16x16xf32> -> vector<16x16xf32>
    %31 = arith.addf %22, %30 : vector<16x16xf32>
    %c128 = arith.constant 128 : index
    %c0_12 = arith.constant 0 : index
    %32 = vector.load %arg3[%c128, %c0_12] : memref<132x16xf32, #tpu.memory_space<vmem>>, vector<1x16xf32>
    %c129 = arith.constant 129 : index
    %c0_13 = arith.constant 0 : index
    %33 = vector.load %arg3[%c129, %c0_13] : memref<132x16xf32, #tpu.memory_space<vmem>>, vector<1x16xf32>
    %34 = arith.fptosi %33 : vector<1x16xf32> to vector<1x16xi32>
    %35 = vector.broadcast %32 : vector<1x16xf32> to vector<16x16xf32>
    %36 = arith.addf %31, %35 : vector<16x16xf32>
    %cst_14 = arith.constant 0.000000e+00 : f32
    %37 = vector.broadcast %cst_14 : f32 to vector<16x16xf32>
    %38 = arith.maximumf %36, %37 : vector<16x16xf32>
    %39 = vector.shape_cast %38 : vector<16x16xf32> to vector<2x8x16xf32>
    %40 = tpu.iota {dimensions = array<i32: 1>} : vector<2x8x16xi32>
    %41 = vector.shape_cast %34 : vector<1x16xi32> to vector<1x1x16xi32>
    %42 = vector.broadcast %41 : vector<1x1x16xi32> to vector<2x8x16xi32>
    %43 = arith.cmpi slt, %40, %42 : vector<2x8x16xi32>
    %cst_15 = arith.constant 0.000000e+00 : f32
    %44 = vector.broadcast %cst_15 : f32 to vector<2x8x16xf32>
    %45 = arith.select %43, %39, %44 : vector<2x8x16xi1>, vector<2x8x16xf32>
    %cst_16 = arith.constant dense<0xFF800000> : vector<2x16xf32>
    %46 = vector.multi_reduction <maximumf>, %45, %cst_16 [1] : vector<2x8x16xf32> to vector<2x16xf32>
    %c96 = arith.constant 96 : index
    %c0_17 = arith.constant 0 : index
    %47 = vector.load %arg3[%c96, %c0_17] : memref<132x16xf32, #tpu.memory_space<vmem>>, vector<16x16xf32>
    %c112 = arith.constant 112 : index
    %c0_18 = arith.constant 0 : index
    %48 = vector.load %arg3[%c112, %c0_18] : memref<132x16xf32, #tpu.memory_space<vmem>>, vector<16x16xf32>
    %c130 = arith.constant 130 : index
    %c0_19 = arith.constant 0 : index
    %49 = vector.load %arg3[%c130, %c0_19] : memref<132x16xf32, #tpu.memory_space<vmem>>, vector<1x16xf32>
    %c131 = arith.constant 131 : index
    %c0_20 = arith.constant 0 : index
    %50 = vector.load %arg3[%c131, %c0_20] : memref<132x16xf32, #tpu.memory_space<vmem>>, vector<1x16xf32>
    %cst_21 = arith.constant dense<0.000000e+00> : vector<2x16xf32>
    %51 = tpu.matmul %46, %47, %cst_21 {dimension_numbers = #tpu.dot_dimension_numbers<[1], [0], [0], [1], [0, 0, 1, 1], [], []>, precision = #tpu.contract_precision<fp32>} : vector<2x16xf32>, vector<16x16xf32>, vector<2x16xf32> -> vector<2x16xf32>
    %52 = vector.broadcast %49 : vector<1x16xf32> to vector<2x16xf32>
    %53 = arith.addf %51, %52 : vector<2x16xf32>
    %cst_22 = arith.constant 0.000000e+00 : f32
    %54 = vector.broadcast %cst_22 : f32 to vector<2x16xf32>
    %55 = arith.maximumf %53, %54 : vector<2x16xf32>
    %cst_23 = arith.constant dense<0.000000e+00> : vector<2x16xf32>
    %56 = tpu.matmul %46, %48, %cst_23 {dimension_numbers = #tpu.dot_dimension_numbers<[1], [0], [0], [1], [0, 0, 1, 1], [], []>, precision = #tpu.contract_precision<fp32>} : vector<2x16xf32>, vector<16x16xf32>, vector<2x16xf32> -> vector<2x16xf32>
    %57 = vector.broadcast %50 : vector<1x16xf32> to vector<2x16xf32>
    %58 = arith.addf %56, %57 : vector<2x16xf32>
    %cst_24 = arith.constant 0.000000e+00 : f32
    %59 = vector.broadcast %cst_24 : f32 to vector<2x16xf32>
    %60 = arith.subf %59, %58 : vector<2x16xf32>
    %61 = math.exp %60 : vector<2x16xf32>
    %cst_25 = arith.constant 1.000000e+00 : f32
    %62 = vector.broadcast %cst_25 : f32 to vector<2x16xf32>
    %63 = arith.addf %62, %61 : vector<2x16xf32>
    %cst_26 = arith.constant 1.000000e+00 : f32
    %64 = vector.broadcast %cst_26 : f32 to vector<2x16xf32>
    %65 = arith.divf %64, %63 : vector<2x16xf32>
    %66 = arith.mulf %65, %55 : vector<2x16xf32>
    %cst_27 = arith.constant 1.000000e+00 : f32
    %67 = vector.broadcast %cst_27 : f32 to vector<2x16xf32>
    %68 = arith.subf %67, %65 : vector<2x16xf32>
    %69 = arith.mulf %68, %46 : vector<2x16xf32>
    %70 = arith.addf %66, %69 : vector<2x16xf32>
    %c0_28 = arith.constant 0 : index
    %c0_29 = arith.constant 0 : index
    %71 = vector.load %arg4[%c0_28, %c0_29] : memref<17x128xf32, #tpu.memory_space<vmem>>, vector<16x128xf32>
    %c16 = arith.constant 16 : index
    %c0_30 = arith.constant 0 : index
    %72 = vector.load %arg4[%c16, %c0_30] : memref<17x128xf32, #tpu.memory_space<vmem>>, vector<1x128xf32>
    %cst_31 = arith.constant dense<0.000000e+00> : vector<2x128xf32>
    %73 = tpu.matmul %70, %71, %cst_31 {dimension_numbers = #tpu.dot_dimension_numbers<[1], [0], [0], [1], [0, 0, 1, 1], [], []>, precision = #tpu.contract_precision<fp32>} : vector<2x16xf32>, vector<16x128xf32>, vector<2x128xf32> -> vector<2x128xf32>
    %74 = vector.broadcast %72 : vector<1x128xf32> to vector<2x128xf32>
    %75 = arith.addf %73, %74 : vector<2x128xf32>
    %c0_32 = arith.constant 0 : index
    %c0_33 = arith.constant 0 : index
    %76 = vector.load %arg5[%c0_32, %c0_33] : memref<2x128xf32, #tpu.memory_space<vmem>>, vector<2x128xf32>
    tpu.vector_store %arg5[%c0_32, %c0_33], %75 {strides = array<i32>} : memref<2x128xf32, #tpu.memory_space<vmem>>, vector<2x128xf32>,
    return
  }
  func.func @transform_0(%arg0: i32) -> (i32, i32) {
    %c0_i32 = arith.constant 0 : i32
    %c0_i32_0 = arith.constant 0 : i32
    return %arg0, %c0_i32 : i32, i32
  }
  func.func @transform_1(%arg0: i32) -> (i32, i32) {
    %c0_i32 = arith.constant 0 : i32
    %c0_i32_0 = arith.constant 0 : i32
    %c0_i32_1 = arith.constant 0 : i32
    return %c0_i32, %c0_i32_0 : i32, i32
  }
  func.func @transform_2(%arg0: i32) -> (i32, i32) {
    %c0_i32 = arith.constant 0 : i32
    %c0_i32_0 = arith.constant 0 : i32
    %c0_i32_1 = arith.constant 0 : i32
    return %c0_i32, %c0_i32_0 : i32, i32
  }
  func.func @transform_3(%arg0: i32) -> (i32, i32) {
    %c0_i32 = arith.constant 0 : i32
    %c0_i32_0 = arith.constant 0 : i32
    %c0_i32_1 = arith.constant 0 : i32
    return %c0_i32, %c0_i32_0 : i32, i32
  }
  func.func @transform_4(%arg0: i32) -> (i32, i32) {
    %c0_i32 = arith.constant 0 : i32
    %c0_i32_0 = arith.constant 0 : i32
    return %arg0, %c0_i32 : i32, i32
  }
}

</mosaic_0001>

<bundles_post_ra>
// kernel: discriminator_forward.1
= control target key start
LH: loop header
LB: loop body
LE: loop exit
PB: predicated region body
PF: predicated region fallthrough
CT: control target
= control target key end

     0   :  { %v19_v0 = vlaneseq  ;;  %s6862_s0 = inlined_call_operand.vmem [shape: s32[2,8], index: 0, kind: input, shape index: {}]   ;;  %s6863_s1 = inlined_call_operand.vmem [shape: f32[128,32], index: 1, kind: input, shape index: {}]   ;;  %s6864_s2 = inlined_call_operand.vmem [shape: f32[132,16], index: 2, kind: input, shape index: {}]   ;;  %s6865_s3 = inlined_call_operand.vmem [shape: f32[17,128], index: 3, kind: input, shape index: {}]   ;;  %s6866_s4 = inlined_call_operand.hbm [shape: f32[2,128], index: 4, kind: output, shape index: {}]  }
   0x1   :  { %v56_v1 = vld [vmem:[%s6863_s1 + $0x78] sm:$0xff]  ;;  %v55_v3 = vld [vmem:[%s6863_s1 + $0x70] sm:$0xff]  ;;  %v54_v4 = vld [vmem:[%s6863_s1 + $0x68] sm:$0xff] }
   0x2   :  { %v5876_v2 = vand.u32 4294901760, %v56_v1  ;;  %v53_v5 = vld [vmem:[%s6863_s1 + $0x60] sm:$0xff]  ;;  %v5888_v6 = vshrl.u32 %v19_v0, 7  ;;  %v5890_v7 = vand.u32 4294901760, %v55_v3  ;;  %v5892_v8 = vand.u32 4294901760, %v54_v4  ;;  %v52_v10 = vld [vmem:[%s6863_s1 + $0x58] sm:$0xff] }
   0x3   :  { %v5894_v9 = vand.u32 4294901760, %v53_v5  ;;  %v51_v11 = vld [vmem:[%s6863_s1 + $0x50] sm:$0xff]  ;;  %v18_v12 = vld [vmem:[%s6862_s0] sm:$0x3]  ;;  %v5908_v14 = vand.u32 4294901760, %v52_v10  ;;  %v50_v24 = vld [vmem:[%s6863_s1 + $0x48] sm:$0xff] }
   0x4   :  { %v5906_v13 = vsub.f32 %v56_v1, %v5876_v2  ;;  %5194 = vmatprep.subr.mxu0 %v5876_v2  ;;  %v5911_v15 = vand.u32 4294901760, %v51_v11  ;;  %v23_v16 = vsub.s32 0, %v5888_v6  ;;  %v30_v17 = vsub.s32 1, %v5888_v6 }
   0x5   :  { %v5916_v18 = vsub.f32 %v55_v3, %v5890_v7  ;;  %v5919_v19 = vsub.f32 %v54_v4, %v5892_v8  ;;  %5195 = vmatpush3.msra.mxu0 %v5876_v2  ;;  %v5926_v21 = vsub.f32 %v53_v5, %v5894_v9  ;;  %v5929_v22 = vsub.f32 %v52_v10, %v5908_v14 }
   0x6   :  { %v5923_v20 = vand.u32 4294901760, %v5906_v13  ;;  %v5932_v23 = vsub.f32 %v51_v11, %v5911_v15  ;;  %5196 = vmatprep.subr.mxu0 %v5890_v7  ;;  %v24_v25 = vrot.slane %v18_v12, %v23_v16 }
   0x7   :  { %v5941_v26 = vand.u32 4294901760, %v5916_v18  ;;  %5197 = vmatpush3.msra.mxu0 %v5890_v7 }
   0x8   :  { %9 = vsyncpa [#allocation3], 0  ;;  %v162_v27 = vsub.f32 %v5906_v13, %v5923_v20  ;;  %v5947_v28 = vand.u32 4294901760, %v5919_v19  ;;  %v5950_v29 = vand.u32 4294901760, %v5926_v21  ;;  %v5953_v30 = vand.u32 4294901760, %v5929_v22  ;;  %5198 = vmatprep.subr.mxu0 %v5892_v8  ;;  %v49_v31 = vld [vmem:[%s6863_s1 + $0x40] sm:$0xff] }
   0x9   :  { %26 = vbcast.lane.b32.xlu0 %v24_v25, 256  ;;  %v31_v32 = vrot.slane %v18_v12, %v30_v17  ;;  %v169_v33 = vsub.f32 %v5916_v18, %v5941_v26  ;;  %v5962_v34 = vand.u32 4294901760, %v5932_v23  ;;  %v5964_v35 = vand.u32 4294901760, %v50_v24  ;;  %5199 = vmatpush3.msra.mxu0 %v5892_v8  ;;  %v48_v36 = vld [vmem:[%s6863_s1 + $0x38] sm:$0xff]  ;;  %v47_v40 = vld [vmem:[%s6863_s1 + $0x30] sm:$0xff]  ;;  %v46_v45 = vld [vmem:[%s6863_s1 + $0x28] sm:$0xff] }
   0xa   :  { %v163_v37 = vand.u32 4294901760, %v162_v27  ;;  %v176_v38 = vsub.f32 %v5919_v19, %v5947_v28  ;;  %v183_v39 = vsub.f32 %v5926_v21, %v5950_v29  ;;  %5200 = vmatprep.subr.mxu0 %v5894_v9  ;;  %v190_v42 = vsub.f32 %v5929_v22, %v5953_v30  ;;  %v45_v46 = vld [vmem:[%s6863_s1 + $0x20] sm:$0xff]  ;;  %v44_v53 = vld [vmem:[%s6863_s1 + $0x18] sm:$0xff]  ;;  %v43_v58 = vld [vmem:[%s6863_s1 + $0x10] sm:$0xff]  ;;  %s5847_s11 = smov [#allocation2]  }
   0xb   :  { %v170_v41 = vand.u32 4294901760, %v169_v33  ;;  %v5981_v43 = vsub.f32 %v50_v24, %v5964_v35  ;;  %v5983_v44 = vand.u32 4294901760, %v49_v31  ;;  %5201 = vmatpush3.msra.mxu0 %v5894_v9  ;;  %v5992_v48 = vand.u32 4294901760, %v48_v36  ;;  %v42_v17 = vld [vmem:[%s6863_s1 + $0x8] sm:$0xff]  ;;  %v41_v24 = vld [vmem:[%s6863_s1] sm:$0xff]  ;;  %s4840_s12 = sshll.u32 %s5847_s11, 4  ;;  %s4841_s12 = int_to_ptr.vmem [resolvable:$true] %s4840_s12 }
   0xc   :  { %5229 = vmatprep.subr.mxu1 %v163_v37  ;;  %v177_v47 = vand.u32 4294901760, %v176_v38  ;;  %5202 = vmatprep.subr.mxu0 %v5908_v14  ;;  %v197_v49 = vsub.f32 %v5932_v23, %v5962_v34  ;;  %v6003_v52 = vand.u32 4294901760, %v47_v40  ;;  %v184_v54 = vand.u32 4294901760, %v183_v39  ;;  %s5822_s13 = scalar_lea.vmem %s4841_s12, 32  ;;  %p5827_p1 = scmp.lt.s32.totalorder %s4841_s12, %s4841_s12 }
   0xd   :  { %33 = vbcast.lane.b32.xlu0 %v31_v32, 256  ;;  %5230 = vmatpush3.msra.mxu1 %v163_v37  ;;  %v5998_v50 = vand.u32 4294901760, %v5981_v43  ;;  %v6001_v51 = vsub.f32 %v49_v31, %v5983_v44  ;;  %v6009_v55 = vsub.f32 %v48_v36, %v5992_v48  ;;  %v6012_v56 = vand.u32 4294901760, %v46_v45  ;;  %p5823_p0 = scmp.ne.s32.totalorder %s4841_s12, %s5822_s13  ;;  %p5828_p2 = scmp.lt.s32.totalorder %s5822_s13, %s5822_s13 }
   0xe   :  { %5231 = vmatprep.subr.mxu1 %v170_v41  ;;  %5203 = vmatpush3.msra.mxu0 %v5908_v14  ;;  %v6014_v57 = vand.u32 4294901760, %v45_v46  ;;  %v191_v59 = vand.u32 4294901760, %v190_v42  ;;  %v6023_v61 = vsub.f32 %v47_v40, %v6003_v52  ;;  %v6035_v3 = vand.u32 4294901760, %v44_v53 }
   0xf   :  { %5232 = vmatpush3.msra.mxu1 %v170_v41  ;;  %v6020_v60 = vand.u32 4294901760, %v6001_v51  ;;  %5204 = vmatprep.subr.mxu0 %v5911_v15  ;;  %v204_v62 = vsub.f32 %v5981_v43, %v5998_v50  ;;  %v6029_v63 = vand.u32 4294901760, %v6009_v55  ;;  %v6033_v1 = vsub.f32 %v46_v45, %v6012_v56  ;;  %p5829_p3 = por %p5828_p2, %p5827_p1 }
  0x10   :  { %5233 = vmatprep.subr.mxu1 %v177_v47  ;;  %5205 = vmatpush3.msra.mxu0 %v5911_v15  ;;  %v6038_v4 = vand.u32 4294901760, %v43_v58  ;;  %v198_v5 = vand.u32 4294901760, %v197_v49  ;;  %v6043_v11 = vand.u32 4294901760, %v6023_v61  ;;  %v6047_v12 = vsub.f32 %v45_v46, %v6014_v57 }
  0x11   :  { %5234 = vmatpush3.msra.mxu1 %v177_v47  ;;  %5206 = vmatprep.subr.mxu0 %v5964_v35  ;;  %v211_v10 = vsub.f32 %v6001_v51, %v6020_v60  ;;  %v205_v25 = vand.u32 4294901760, %v204_v62  ;;  %v218_v27 = vsub.f32 %v6009_v55, %v6029_v63  ;;  %v6059_v31 = vand.u32 4294901760, %v6033_v1  ;;  %p5830_p4 = pnand %p5829_p3, %p5823_p0 }
  0x12   :  { %5235 = vmatprep.subr.mxu1 %v184_v54  ;;  %5207 = vmatpush3.msra.mxu0 %v5964_v35  ;;  %v6063_v32 = vsub.f32 %v44_v53, %v6035_v3  ;;  %v6067_v33 = vsub.f32 %v43_v58, %v6038_v4  ;;  %v6069_v36 = vand.u32 4294901760, %v42_v17  ;;  %v225_v38 = vsub.f32 %v6023_v61, %v6043_v11 }
  0x13   :  { %5236 = vmatpush3.msra.mxu1 %v184_v54  ;;  %5208 = vmatprep.subr.mxu0 %v5983_v44  ;;  %v212_v37 = vand.u32 4294901760, %v211_v10  ;;  %v6074_v39 = vand.u32 4294901760, %v6047_v12  ;;  %v6077_v40 = vand.u32 4294901760, %v41_v24  ;;  %v219_v41 = vand.u32 4294901760, %v218_v27 }
  0x14   :  { %5237 = vmatprep.subr.mxu1 %v191_v59  ;;  %5209 = vmatpush3.msra.mxu0 %v5983_v44  ;;  %v232_v42 = vsub.f32 %v6033_v1, %v6059_v31  ;;  %v6083_v45 = vand.u32 4294901760, %v6063_v32  ;;  %v6087_v46 = vsub.f32 %v42_v17, %v6069_v36  ;;  %v226_v47 = vand.u32 4294901760, %v225_v38 }
  0x15   :  { %5238 = vmatpush3.msra.mxu1 %v191_v59  ;;  %5210 = vmatprep.subr.mxu0 %v5992_v48  ;;  %v239_v49 = vsub.f32 %v6047_v12, %v6074_v39  ;;  %v6093_v53 = vand.u32 4294901760, %v6067_v33  ;;  %v6097_v54 = vsub.f32 %v41_v24, %v6077_v40  ;;  %vm752_vm2 = vcmask 261120  }
  0x16   :  { %5239 = vmatprep.subr.mxu1 %v198_v5  ;;  %5211 = vmatpush3.msra.mxu0 %v5992_v48  ;;  %v233_v58 = vand.u32 4294901760, %v232_v42  ;;  %v246_v59 = vsub.f32 %v6063_v32, %v6083_v45  ;;  %v6103_v62 = vand.u32 4294901760, %v6087_v46  ;;  %v6126_v42 = vand.u32 127, %v19_v0 }
  0x17   :  { %5240 = vmatpush3.msra.mxu1 %v198_v5  ;;  %5212 = vmatprep.subr.mxu0 %v6003_v52  ;;  %v240_v5 = vand.u32 4294901760, %v239_v49  ;;  %v253_v10 = vsub.f32 %v6067_v33, %v6093_v53  ;;  %v6110_v17 = vand.u32 4294901760, %v6097_v54  ;;  %v5844_v49 = vmov 0.0  }
  0x18   :  { %5241 = vmatprep.subr.mxu1 %v205_v25  ;;  %5213 = vmatpush3.msra.mxu0 %v6003_v52  ;;  %v247_v24 = vand.u32 4294901760, %v246_v59  ;;  %v5845_v59 = vmov 1.0   ;;  %vm1295_vm4 = vcmask 130048   ;;  %vm5846_vm8 = vmmov 0  }
  0x19   :  { %5242 = vmatpush3.msra.mxu1 %v205_v25  ;;  %5214 = vmatprep.subr.mxu0 %v6012_v56  ;;  %v260_v25 = vsub.f32 %v6087_v46, %v6103_v62  ;;  %v254_v27 = vand.u32 4294901760, %v253_v10  ;;  %vm3426_vm10 = vcmask 1041409  }
  0x1a   :  { %5243 = vmatprep.subr.mxu1 %v212_v37  ;;  %5215 = vmatpush3.msra.mxu0 %v6012_v56 }
  0x1b   :  { %5244 = vmatpush3.msra.mxu1 %v212_v37  ;;  %5216 = vmatprep.subr.mxu0 %v6014_v57  ;;  %v267_v37 = vsub.f32 %v6097_v54, %v6110_v17  ;;  %v261_v38 = vand.u32 4294901760, %v260_v25 }
  0x1c   :  { %5245 = vmatprep.subr.mxu1 %v219_v41  ;;  %5217 = vmatpush3.msra.mxu0 %v6014_v57 }
  0x1d   :  { %5246 = vmatpush3.msra.mxu1 %v219_v41  ;;  %5218 = vmatprep.subr.mxu0 %v6035_v3  ;;  %v268_v41 = vand.u32 4294901760, %v267_v37 }
  0x1e   :  { %5247 = vmatprep.subr.mxu1 %v226_v47  ;;  %5219 = vmatpush3.msra.mxu0 %v6035_v3 }
  0x1f   :  { %5248 = vmatpush3.msra.mxu1 %v226_v47  ;;  %5220 = vmatprep.subr.mxu0 %v6038_v4 }
  0x20   :  { %5249 = vmatprep.subr.mxu1 %v233_v58  ;;  %5221 = vmatpush3.msra.mxu0 %v6038_v4 }
  0x21   :  { %5250 = vmatpush3.msra.mxu1 %v233_v58  ;;  %5222 = vmatprep.subr.mxu0 %v6069_v36 }
  0x22   :  { %5251 = vmatprep.subr.mxu1 %v240_v5  ;;  %5223 = vmatpush3.msra.mxu0 %v6069_v36 }
  0x23   :  { %5252 = vmatpush3.msra.mxu1 %v240_v5  ;;  %5224 = vmatprep.subr.mxu0 %v6077_v40 }
  0x24   :  { %5253 = vmatprep.subr.mxu1 %v247_v24  ;;  %5225 = vmatpush3.msra.mxu0 %v6077_v40 }
  0x25   :  { %5254 = vmatpush3.msra.mxu1 %v247_v24  ;;  %5264 = vmatprep.subr.mxu0 %v5906_v13 }
  0x26   :  { %5255 = vmatprep.subr.mxu1 %v254_v27 }
  0x27   :  { %5256 = vmatpush3.msra.mxu1 %v254_v27 }
  0x28   :  { %5257 = vmatprep.subr.mxu1 %v261_v38 }
  0x29   :  { %5258 = vmatpush3.msra.mxu1 %v261_v38 }
  0x2a   :  { %5259 = vmatprep.subr.mxu1 %v268_v41 }
  0x2b   :  { %5260 = vmatpush3.msra.mxu1 %v268_v41 }
  0x2c   :  { %5299 = vmatprep.subr.mxu1 %v5876_v2 }
  0x7b   :  { %v6128_v47 = vpop.permute.xlu0 %26 }
  0x7c   :  { %vm35_vm0 = vcmp.eq.s32.totalorder %v6126_v42, %v6128_v47 }
  0x7d   :  { %v4848_v58 = vsel %vm35_vm0, 1.0, %v5844_v49  ;;  %5261 = vmatprep.mubr.msk.f32.mxu1 %vm35_vm0, %v5845_v59 }
  0x7e   :  { %v139_v5 = vsub.f32 %v4848_v58, %v4848_v58 }
  0x7f   :  { %v6140_v0 = vpop.permute.xlu0 %33 }
  0x80   :  { %vm36_vm1 = vcmp.eq.s32.totalorder %v6126_v42, %v6140_v0  ;;  %v140_v10 = vand.u32 4294901760, %v139_v5 }
  0x81   :  { %v4849_v24 = vsel %vm36_vm1, 1.0, %v5844_v49  ;;  %5262 = vmatmul.mubr.msk.f32.vlgmr.msra.gmra.mxu1 %vm36_vm1, %v5845_v59 }
  0x82   :  { %v6152_v25 = vsub.f32 %v4849_v24, %v4849_v24  ;;  %5300 = vmatpush3.msra.mxu1 %v5876_v2  ;;  %5331 = vmatprep.mubr.f32.mxu1 %v140_v10  ;;  %v141_v27 = vsub.f32 %v139_v5, %v140_v10 }
  0x83   :  { %5301 = vmatprep.subr.mxu1 %v5890_v7 }
  0x84   :  { %5302 = vmatpush3.msra.mxu1 %v5890_v7  ;;  %v142_v37 = vand.u32 4294901760, %v141_v27  ;;  %v150_v38 = vand.u32 4294901760, %v6152_v25 }
  0x85   :  { %5303 = vmatprep.subr.mxu1 %v5892_v8 }
  0x86   :  { %5304 = vmatpush3.msra.mxu1 %v5892_v8  ;;  %5226 = vmatprep.mubr.f32.mxu0 %v142_v37  ;;  %v151_v41 = vsub.f32 %v6152_v25, %v150_v38 }
  0x87   :  { %5305 = vmatprep.subr.mxu1 %v5894_v9 }
  0x88   :  { %5306 = vmatpush3.msra.mxu1 %v5894_v9  ;;  %v152_v58 = vand.u32 4294901760, %v151_v41  ;;  %v1287_v41 = vadd.s32 1, %v5888_v6 }
  0x89   :  { %5307 = vmatprep.subr.mxu1 %v5908_v14 }
  0x8a   :  { %5308 = vmatpush3.msra.mxu1 %v5908_v14  ;;  %5227 = vmatmul.mubr.f32.vlgmr.msra.gmra.mxu0 %v152_v58  ;;  %vm1289_vm3 = vcmp.eq.s32.totalorder %v6126_v42, %v1287_v41  ;;  %v744_v41 = vld [vmem:[%s6864_s2] sm:$0xff] }
  0x8b   :  { %5265 = vmatpush3.msra.mxu0 %v5906_v13  ;;  %5309 = vmatprep.subr.mxu1 %v5911_v15  ;;  %v6430_v58 = vsel %vm1289_vm3, 1.0, %v5844_v49 }
  0x8c   :  { %5266 = vmatprep.subr.mxu0 %v5916_v18  ;;  %5296 = vmatprep.mubr.f32.mxu0 %v139_v5 }
  0x8d   :  { %5310 = vmatpush3.msra.mxu1 %v5911_v15  ;;  %5267 = vmatpush3.msra.mxu0 %v5916_v18 }
  0x8e   :  { %5311 = vmatprep.subr.mxu1 %v5964_v35  ;;  %5268 = vmatprep.subr.mxu0 %v5919_v19 }
  0x8f   :  { %5312 = vmatpush3.msra.mxu1 %v5964_v35  ;;  %5269 = vmatpush3.msra.mxu0 %v5919_v19 }
  0x90   :  { %5313 = vmatprep.subr.mxu1 %v5983_v44  ;;  %5270 = vmatprep.subr.mxu0 %v5926_v21 }
  0x91   :  { %5314 = vmatpush3.msra.mxu1 %v5983_v44  ;;  %5271 = vmatpush3.msra.mxu0 %v5926_v21 }
  0x92   :  { %5315 = vmatprep.subr.mxu1 %v5992_v48  ;;  %5272 = vmatprep.subr.mxu0 %v5929_v22 }
  0x93   :  { %5316 = vmatpush3.msra.mxu1 %v5992_v48  ;;  %5273 = vmatpush3.msra.mxu0 %v5929_v22 }
  0x94   :  { %5317 = vmatprep.subr.mxu1 %v6003_v52  ;;  %5274 = vmatprep.subr.mxu0 %v5932_v23 }
  0x95   :  { %5318 = vmatpush3.msra.mxu1 %v6003_v52  ;;  %5275 = vmatpush3.msra.mxu0 %v5932_v23 }
  0x96   :  { %5319 = vmatprep.subr.mxu1 %v6012_v56  ;;  %5276 = vmatprep.subr.mxu0 %v5981_v43 }
  0x97   :  { %5320 = vmatpush3.msra.mxu1 %v6012_v56  ;;  %5277 = vmatpush3.msra.mxu0 %v5981_v43 }
  0x98   :  { %5321 = vmatprep.subr.mxu1 %v6014_v57  ;;  %5278 = vmatprep.subr.mxu0 %v6001_v51 }
  0x99   :  { %5322 = vmatpush3.msra.mxu1 %v6014_v57  ;;  %5279 = vmatpush3.msra.mxu0 %v6001_v51 }
  0x9a   :  { %5323 = vmatprep.subr.mxu1 %v6035_v3  ;;  %5280 = vmatprep.subr.mxu0 %v6009_v55 }
  0x9b   :  { %5324 = vmatpush3.msra.mxu1 %v6035_v3  ;;  %5281 = vmatpush3.msra.mxu0 %v6009_v55 }
  0x9c   :  { %5325 = vmatprep.subr.mxu1 %v6038_v4  ;;  %5282 = vmatprep.subr.mxu0 %v6023_v61 }
  0x9d   :  { %5326 = vmatpush3.msra.mxu1 %v6038_v4  ;;  %5283 = vmatpush3.msra.mxu0 %v6023_v61 }
  0x9e   :  { %5327 = vmatprep.subr.mxu1 %v6069_v36  ;;  %5284 = vmatprep.subr.mxu0 %v6033_v1 }
  0x9f   :  { %5328 = vmatpush3.msra.mxu1 %v6069_v36  ;;  %5285 = vmatpush3.msra.mxu0 %v6033_v1 }
  0xa0   :  { %5329 = vmatprep.subr.mxu1 %v6077_v40  ;;  %5286 = vmatprep.subr.mxu0 %v6047_v12 }
  0xa1   :  { %5330 = vmatpush3.msra.mxu1 %v6077_v40  ;;  %5287 = vmatpush3.msra.mxu0 %v6047_v12 }
  0xa2   :  { %5332 = vmatmul.mubr.f32.vlgmr.msra.gmra.mxu1 %v150_v38  ;;  %5369 = vmatprep.subr.mxu1 %v5876_v2 }
  0xa3   :  { %5288 = vmatprep.subr.mxu0 %v6063_v32  ;;  %5370 = vmatpush3.msra.mxu1 %v5876_v2  ;;  %v751_v2 = vld [vmem:[%s6864_s2 + $0x38] sm:$0xff] }
  0xa4   :  { %5401 = vmatprep.mubr.msk.f32.mxu1 %vm35_vm0, %v5845_v59  ;;  %5289 = vmatpush3.msra.mxu0 %v6063_v32 }
  0xa5   :  { %5371 = vmatprep.subr.mxu1 %v5890_v7  ;;  %5290 = vmatprep.subr.mxu0 %v6067_v33 }
  0xa6   :  { %5372 = vmatpush3.msra.mxu1 %v5890_v7  ;;  %5291 = vmatpush3.msra.mxu0 %v6067_v33  ;;  %v6302_v7 = vand.u32 4294901760, %v751_v2 }
  0xa7   :  { %5373 = vmatprep.subr.mxu1 %v5892_v8  ;;  %5292 = vmatprep.subr.mxu0 %v6087_v46 }
  0xa8   :  { %5374 = vmatpush3.msra.mxu1 %v5892_v8  ;;  %5293 = vmatpush3.msra.mxu0 %v6087_v46  ;;  %v750_v8 = vld [vmem:[%s6864_s2 + $0x30] sm:$0xff] }
  0xa9   :  { %5375 = vmatprep.subr.mxu1 %v5894_v9  ;;  %5294 = vmatprep.subr.mxu0 %v6097_v54  ;;  %v6310_v13 = vand.u32 4294901760, %v750_v8 }
  0xaa   :  { %5376 = vmatpush3.msra.mxu1 %v5894_v9  ;;  %5295 = vmatpush3.msra.mxu0 %v6097_v54  ;;  %v6308_v9 = vsub.f32 %v751_v2, %v6302_v7  ;;  %v1297_v2 = vsel %vm1295_vm4, %v6430_v58, 0 }
  0xab   :  { %5377 = vmatprep.subr.mxu1 %v5908_v14  ;;  %5297 = vmatmul.mubr.f32.vlgmr.msra.gmra.mxu0 %v6152_v25  ;;  %v6321_v18 = vsub.f32 %v750_v8, %v6310_v13 }
  0xac   :  { %5334 = vmatprep.subr.mxu0 %v5923_v20  ;;  %5378 = vmatpush3.msra.mxu1 %v5908_v14  ;;  %v749_v14 = vld [vmem:[%s6864_s2 + $0x28] sm:$0xff] }
  0xad   :  { %5335 = vmatpush3.msra.mxu0 %v5923_v20  ;;  %5366 = vmatprep.mubr.msk.f32.mxu0 %vm35_vm0, %v5845_v59  ;;  %v6323_v19 = vand.u32 4294901760, %v749_v14  ;;  %v748_v20 = vld [vmem:[%s6864_s2 + $0x20] sm:$0xff]  ;;  %v6333_v22 = vand.u32 4294901760, %v6321_v18 }
  0xae   :  { %5379 = vmatprep.subr.mxu1 %v5911_v15  ;;  %5336 = vmatprep.subr.mxu0 %v5941_v26 }
  0xaf   :  { %5380 = vmatpush3.msra.mxu1 %v5911_v15  ;;  %5337 = vmatpush3.msra.mxu0 %v5941_v26  ;;  %v6318_v15 = vand.u32 4294901760, %v6308_v9  ;;  %v6336_v23 = vsub.f32 %v749_v14, %v6323_v19  ;;  %v6338_v26 = vand.u32 4294901760, %v748_v20  ;;  %v6443_v14 = vadd.s32 8, %v5888_v6 }
  0xb0   :  { %5381 = vmatprep.subr.mxu1 %v5964_v35  ;;  %5338 = vmatprep.subr.mxu0 %v5947_v28 }
  0xb1   :  { %5382 = vmatpush3.msra.mxu1 %v5964_v35  ;;  %5339 = vmatpush3.msra.mxu0 %v5947_v28  ;;  %v876_v21 = vsub.f32 %v6308_v9, %v6318_v15 }
  0xb2   :  { %5383 = vmatprep.subr.mxu1 %v5983_v44  ;;  %5340 = vmatprep.subr.mxu0 %v5950_v29 }
  0xb3   :  { %5384 = vmatpush3.msra.mxu1 %v5983_v44  ;;  %5341 = vmatpush3.msra.mxu0 %v5950_v29  ;;  %v877_v28 = vand.u32 4294901760, %v876_v21  ;;  %v883_v29 = vsub.f32 %v6321_v18, %v6333_v22 }
  0xb4   :  { %5385 = vmatprep.subr.mxu1 %v5992_v48  ;;  %5342 = vmatprep.subr.mxu0 %v5953_v30 }
  0xb5   :  { %5386 = vmatpush3.msra.mxu1 %v5992_v48  ;;  %5343 = vmatpush3.msra.mxu0 %v5953_v30  ;;  %v6345_v30 = vand.u32 4294901760, %v6336_v23  ;;  %v884_v35 = vand.u32 4294901760, %v883_v29 }
  0xb6   :  { %5387 = vmatprep.subr.mxu1 %v6003_v52  ;;  %5344 = vmatprep.subr.mxu0 %v5962_v34 }
  0xb7   :  { %5388 = vmatpush3.msra.mxu1 %v6003_v52  ;;  %5345 = vmatpush3.msra.mxu0 %v5962_v34  ;;  %v6348_v34 = vsub.f32 %v748_v20, %v6338_v26  ;;  %v890_v43 = vsub.f32 %v6336_v23, %v6345_v30 }
  0xb8   :  { %5389 = vmatprep.subr.mxu1 %v6012_v56  ;;  %5346 = vmatprep.subr.mxu0 %v5998_v50 }
  0xb9   :  { %5390 = vmatpush3.msra.mxu1 %v6012_v56  ;;  %5347 = vmatpush3.msra.mxu0 %v5998_v50  ;;  %v6355_v44 = vand.u32 4294901760, %v6348_v34  ;;  %v891_v48 = vand.u32 4294901760, %v890_v43 }
  0xba   :  { %5391 = vmatprep.subr.mxu1 %v6014_v57  ;;  %5348 = vmatprep.subr.mxu0 %v6020_v60 }
  0xbb   :  { %5392 = vmatpush3.msra.mxu1 %v6014_v57  ;;  %5349 = vmatpush3.msra.mxu0 %v6020_v60  ;;  %v897_v50 = vsub.f32 %v6348_v34, %v6355_v44 }
  0xbc   :  { %5393 = vmatprep.subr.mxu1 %v6035_v3  ;;  %5350 = vmatprep.subr.mxu0 %v6029_v63 }
  0xbd   :  { %5394 = vmatpush3.msra.mxu1 %v6035_v3  ;;  %5351 = vmatpush3.msra.mxu0 %v6029_v63  ;;  %v898_v51 = vand.u32 4294901760, %v897_v50 }
  0xbe   :  { %5395 = vmatprep.subr.mxu1 %v6038_v4  ;;  %5352 = vmatprep.subr.mxu0 %v6043_v11 }
  0xbf   :  { %5396 = vmatpush3.msra.mxu1 %v6038_v4  ;;  %5353 = vmatpush3.msra.mxu0 %v6043_v11 }
  0xc0   :  { %5397 = vmatprep.subr.mxu1 %v6069_v36  ;;  %5354 = vmatprep.subr.mxu0 %v6059_v31 }
  0xc1   :  { %5398 = vmatpush3.msra.mxu1 %v6069_v36  ;;  %5355 = vmatpush3.msra.mxu0 %v6059_v31 }
  0xc2   :  { %5399 = vmatprep.subr.mxu1 %v6077_v40  ;;  %5356 = vmatprep.subr.mxu0 %v6074_v39 }
  0xc3   :  { %5400 = vmatpush3.msra.mxu1 %v6077_v40  ;;  %5357 = vmatpush3.msra.mxu0 %v6074_v39 }
  0xc4   :  { %5402 = vmatmul.mubr.msk.f32.vlgmr.msra.gmra.mxu1 %vm36_vm1, %v5845_v59  ;;  %5358 = vmatprep.subr.mxu0 %v6083_v45 }
  0xc5   :  { %5359 = vmatpush3.msra.mxu0 %v6083_v45  ;;  %5415 = vmatprep.subr.mxu1 %v877_v28 }
  0xc6   :  { %5360 = vmatprep.subr.mxu0 %v6093_v53  ;;  %5416 = vmatpush3.msra.mxu1 %v877_v28 }
  0xc7   :  { %5361 = vmatpush3.msra.mxu0 %v6093_v53  ;;  %5417 = vmatprep.subr.mxu1 %v884_v35 }
  0xc8   :  { %5362 = vmatprep.subr.mxu0 %v6103_v62  ;;  %5418 = vmatpush3.msra.mxu1 %v884_v35 }
  0xc9   :  { %5363 = vmatpush3.msra.mxu0 %v6103_v62  ;;  %5419 = vmatprep.subr.mxu1 %v891_v48 }
  0xca   :  { %5364 = vmatprep.subr.mxu0 %v6110_v17  ;;  %5420 = vmatpush3.msra.mxu1 %v891_v48 }
  0xcb   :  { %5365 = vmatpush3.msra.mxu0 %v6110_v17  ;;  %5421 = vmatprep.subr.mxu1 %v898_v51 }
  0xcc   :  { %5367 = vmatmul.mubr.msk.f32.vlgmr.msra.gmra.mxu0 %vm36_vm1, %v5845_v59  ;;  %5404 = vmatprep.subr.mxu0 %v6302_v7 }
  0xcd   :  { %5405 = vmatpush3.msra.mxu0 %v6302_v7  ;;  %5422 = vmatpush3.msra.mxu1 %v898_v51 }
  0xce   :  { %5406 = vmatprep.subr.mxu0 %v6310_v13  ;;  %5437 = vmatprep.subr.mxu1 %v6302_v7 }
  0xcf   :  { %5407 = vmatpush3.msra.mxu0 %v6310_v13 }
  0xd0   :  { %5408 = vmatprep.subr.mxu0 %v6323_v19 }
  0xd1   :  { %5409 = vmatpush3.msra.mxu0 %v6323_v19 }
  0xd2   :  { %5410 = vmatprep.subr.mxu0 %v6338_v26 }
  0xd3   :  { %5411 = vmatpush3.msra.mxu0 %v6338_v26 }
  0xd4   :  { %5426 = vmatprep.subr.mxu0 %v6308_v9 }
 0x141   :  { %v5263_v55 = vpop.f32.mrf.mxu1 }
 0x143   :  { %v305_v60 = vpop.f32.mrf.mxu1 }
 0x14a   :  { %v5228_v52 = vpop.f32.mrf.mxu0 }
 0x14b   :  { %v312_v61 = vadd.f32 %v5263_v55, %v5228_v52 }
 0x14c   :  { %v144_v56 = vpop.f32.mrf.mxu0 }
 0x14d   :  { %v306_v3 = vadd.f32 %v305_v60, %v144_v56 }
 0x162   :  { %v5333_v63 = vpop.f32.mrf.mxu1 }
 0x164   :  { %v511_v12 = vpop.f32.mrf.mxu1 }
 0x16b   :  { %v5298_v57 = vpop.f32.mrf.mxu0 }
 0x16c   :  { %v423_v4 = vadd.f32 %v5298_v57, %v312_v61 }
 0x16d   :  { %v415_v1 = vpop.f32.mrf.mxu0 }
 0x16e   :  { %v416_v11 = vadd.f32 %v415_v1, %v306_v3  ;;  %v520_v31 = vadd.f32 %v5333_v63, %v423_v4 }
 0x170   :  { %v512_v39 = vadd.f32 %v511_v12, %v416_v11 }
 0x184   :  { %v5403_v32 = vpop.f32.mrf.mxu1 }
 0x186   :  { %v731_v53 = vpop.f32.mrf.mxu1 }
 0x18c   :  { %v5368_v33 = vpop.f32.mrf.mxu0 }
 0x18d   :  { %v645_v36 = vadd.f32 %v5368_v33, %v520_v31 }
 0x18e   :  { %v638_v40 = vpop.f32.mrf.mxu0 }
 0x18f   :  { %v738_v45 = vadd.f32 %v5403_v32, %v645_v36  ;;  %v639_v46 = vadd.f32 %v638_v40, %v512_v39  ;;  %v747_v39 = vld [vmem:[%s6864_s2 + $0x18] sm:$0xff] }
 0x191   :  { %v757_v54 = vsel %vm752_vm2, %v738_v45, 0  ;;  %v732_v62 = vadd.f32 %v731_v53, %v639_v46  ;;  %v6467_v46 = vand.u32 4294901760, %v747_v39  ;;  %v746_v53 = vld [vmem:[%s6864_s2 + $0x10] sm:$0xff] }
 0x192   :  { %v6361_v17 = vand.u32 4294901760, %v757_v54 }
 0x193   :  { %v754_v47 = vsel %vm752_vm2, %v732_v62, 0 }
 0x194   :  { %v6364_v59 = vsub.f32 %v757_v54, %v6361_v17  ;;  %v6366_v5 = vand.u32 4294901760, %v754_v47 }
 0x196   :  { %v6369_v0 = vsub.f32 %v754_v47, %v6366_v5  ;;  %5423 = vmatprep.mubr.f32.mxu1 %v6366_v5  ;;  %v6373_v10 = vand.u32 4294901760, %v6364_v59  ;;  %v745_v47 = vld [vmem:[%s6864_s2 + $0x8] sm:$0xff] }
 0x197   :  { %5424 = vmatmul.mubr.f32.vlgmr.msra.gmra.mxu1 %v6361_v17 }
 0x198   :  { %5438 = vmatpush3.msra.mxu1 %v6302_v7  ;;  %v6378_v24 = vand.u32 4294901760, %v6369_v0  ;;  %v841_v27 = vsub.f32 %v6364_v59, %v6373_v10 }
 0x199   :  { %5439 = vmatprep.subr.mxu1 %v6310_v13 }
 0x19a   :  { %5440 = vmatpush3.msra.mxu1 %v6310_v13  ;;  %5445 = vmatprep.mubr.f32.mxu1 %v6378_v24  ;;  %v831_v25 = vsub.f32 %v6369_v0, %v6378_v24  ;;  %v6394_v38 = vand.u32 4294901760, %v841_v27  ;;  %v6476_v27 = vand.u32 4294901760, %v746_v53 }
 0x19b   :  { %5441 = vmatprep.subr.mxu1 %v6323_v19 }
 0x19c   :  { %5442 = vmatpush3.msra.mxu1 %v6323_v19  ;;  %v6389_v37 = vand.u32 4294901760, %v831_v25 }
 0x19d   :  { %5443 = vmatprep.subr.mxu1 %v6338_v26 }
 0x19e   :  { %5444 = vmatpush3.msra.mxu1 %v6338_v26  ;;  %5412 = vmatprep.mubr.f32.mxu0 %v6389_v37 }
 0x19f   :  { %5446 = vmatmul.mubr.f32.vlgmr.msra.gmra.mxu1 %v6373_v10  ;;  %5459 = vmatprep.subr.mxu1 %v6302_v7 }
 0x1a0   :  { %5413 = vmatmul.mubr.f32.vlgmr.msra.gmra.mxu0 %v6394_v38  ;;  %5460 = vmatpush3.msra.mxu1 %v6302_v7  ;;  %v6436_v7 = vsub.f32 %v1297_v2, %v1297_v2  ;;  %v1919_v2 = vsub.f32 %v747_v39, %v6467_v46 }
 0x1a1   :  { %5427 = vmatpush3.msra.mxu0 %v6308_v9  ;;  %5467 = vmatprep.mubr.f32.mxu1 %v6366_v5 }
 0x1a2   :  { %5428 = vmatprep.subr.mxu0 %v6321_v18  ;;  %5434 = vmatprep.mubr.f32.mxu0 %v6369_v0  ;;  %v1371_v8 = vand.u32 4294901760, %v6436_v7 }
 0x1a3   :  { %5461 = vmatprep.subr.mxu1 %v6310_v13  ;;  %5429 = vmatpush3.msra.mxu0 %v6321_v18 }
 0x1a4   :  { %5462 = vmatpush3.msra.mxu1 %v6310_v13  ;;  %5430 = vmatprep.subr.mxu0 %v6336_v23  ;;  %v1372_v9 = vsub.f32 %v6436_v7, %v1371_v8 }
 0x1a5   :  { %5463 = vmatprep.subr.mxu1 %v6323_v19  ;;  %5431 = vmatpush3.msra.mxu0 %v6336_v23 }
 0x1a6   :  { %5464 = vmatpush3.msra.mxu1 %v6323_v19  ;;  %5432 = vmatprep.subr.mxu0 %v6348_v34  ;;  %v1373_v13 = vand.u32 4294901760, %v1372_v9  ;;  %v6482_v9 = vand.u32 4294901760, %v745_v47 }
 0x1a7   :  { %5465 = vmatprep.subr.mxu1 %v6338_v26  ;;  %5433 = vmatpush3.msra.mxu0 %v6348_v34 }
 0x1a8   :  { %5466 = vmatpush3.msra.mxu1 %v6338_v26  ;;  %5435 = vmatmul.mubr.f32.vlgmr.msra.gmra.mxu0 %v6364_v59 }
 0x1a9   :  { %5448 = vmatprep.subr.mxu0 %v6318_v15  ;;  %5468 = vmatmul.mubr.f32.vlgmr.msra.gmra.mxu1 %v6361_v17 }
 0x1aa   :  { %5449 = vmatpush3.msra.mxu0 %v6318_v15  ;;  %5456 = vmatprep.mubr.f32.mxu0 %v6366_v5  ;;  %v1288_v15 = vadd.s32 1, %v6443_v14 }
 0x1ab   :  { %5450 = vmatprep.subr.mxu0 %v6333_v22  ;;  %5481 = vmatprep.mubr.msk.f32.mxu1 %vm1295_vm4, %v6430_v58 }
 0x1ac   :  { %5451 = vmatpush3.msra.mxu0 %v6333_v22  ;;  %vm1290_vm5 = vcmp.eq.s32.totalorder %v6126_v42, %v1288_v15  ;;  %v1926_v15 = vsub.f32 %v746_v53, %v6476_v27 }
 0x1ad   :  { %5452 = vmatprep.subr.mxu0 %v6345_v30  ;;  %v6448_v21 = vsel %vm1290_vm5, 1.0, %v5844_v49 }
 0x1ae   :  { %5453 = vmatpush3.msra.mxu0 %v6345_v30  ;;  %v1300_v26 = vsel %vm1295_vm4, %v6448_v21, 0 }
 0x1af   :  { %5454 = vmatprep.subr.mxu0 %v6355_v44  ;;  %v6452_v43 = vsub.f32 %v1300_v26, %v1300_v26 }
 0x1b0   :  { %5455 = vmatpush3.msra.mxu0 %v6355_v44 }
 0x1b1   :  { %5457 = vmatmul.mubr.f32.vlgmr.msra.gmra.mxu0 %v6361_v17  ;;  %v1381_v51 = vand.u32 4294901760, %v6452_v43 }
 0x1b2   :  { %5474 = vmatprep.mubr.f32.mxu0 %v1373_v13  ;;  %v6486_v13 = vand.u32 4294901760, %v744_v41 }
 0x1b3   :  { %v1382_v1 = vsub.f32 %v6452_v43, %v1381_v51 }
 0x1b5   :  { %v1383_v32 = vand.u32 4294901760, %v1382_v1 }
 0x257   :  { %v5425_v19 = vpop.f32.mrf.mxu1 }
 0x259   :  { %v935_v23 = vpop.f32.mrf.mxu1 }
 0x25f   :  { %v5447_v29 = vpop.f32.mrf.mxu1 }
 0x260   :  { %v5414_v18 = vpop.f32.mrf.mxu0 }
 0x261   :  { %v942_v28 = vadd.f32 %v5425_v19, %v5414_v18  ;;  %v1105_v48 = vpop.f32.mrf.mxu1  ;;  %v1920_v18 = vand.u32 4294901760, %v1919_v2  ;;  %v1933_v19 = vsub.f32 %v745_v47, %v6482_v9 }
 0x262   :  { %v834_v20 = vpop.f32.mrf.mxu0 }
 0x263   :  { %v936_v34 = vadd.f32 %v935_v23, %v834_v20  ;;  %v1927_v20 = vand.u32 4294901760, %v1926_v15  ;;  %v1921_v23 = vsub.f32 %v1919_v2, %v1920_v18  ;;  %v1934_v26 = vand.u32 4294901760, %v1933_v19 }
 0x268   :  { %v5436_v22 = vpop.f32.mrf.mxu0 }
 0x269   :  { %v1029_v35 = vadd.f32 %v5436_v22, %v942_v28  ;;  %v5469_v52 = vpop.f32.mrf.mxu1  ;;  %v1940_v22 = vsub.f32 %v744_v41, %v6486_v13  ;;  %v1928_v28 = vsub.f32 %v1926_v15, %v1927_v20 }
 0x26a   :  { %v1021_v30 = vpop.f32.mrf.mxu0 }
 0x26b   :  { %v1022_v44 = vadd.f32 %v1021_v30, %v936_v34  ;;  %v1114_v50 = vadd.f32 %v5447_v29, %v1029_v35  ;;  %v1277_v3 = vpop.f32.mrf.mxu1  ;;  %v1941_v29 = vand.u32 4294901760, %v1940_v22  ;;  %v1922_v30 = vand.u32 4294901760, %v1921_v23 }
 0x26d   :  { %v1106_v57 = vadd.f32 %v1105_v48, %v1022_v44  ;;  %v1942_v34 = vsub.f32 %v1940_v22, %v1941_v29  ;;  %v2334_v44 = vld [vmem:[%s6864_s2 + $0x50] sm:$0xff]  ;;  %v2333_v48 = vld [vmem:[%s6864_s2 + $0x48] sm:$0xff] }
 0x271   :  { %v5458_v55 = vpop.f32.mrf.mxu0 }
 0x272   :  { %v1203_v56 = vadd.f32 %v5458_v55, %v1114_v50  ;;  %v6537_v50 = vand.u32 4294901760, %v2334_v44  ;;  %v6545_v55 = vand.u32 4294901760, %v2333_v48 }
 0x273   :  { %v1196_v60 = vpop.f32.mrf.mxu0 }
 0x274   :  { %v1284_v61 = vadd.f32 %v5469_v52, %v1203_v56  ;;  %v1197_v63 = vadd.f32 %v1196_v60, %v1106_v57  ;;  %v2458_v57 = vsub.f32 %v2334_v44, %v6537_v50 }
 0x276   :  { %v1331_v4 = vand.u32 4294901760, %v1284_v61  ;;  %v1278_v11 = vadd.f32 %v1277_v3, %v1197_v63  ;;  %v2459_v63 = vand.u32 4294901760, %v2458_v57 }
 0x278   :  { %v1419_v12 = vsub.f32 %v1284_v61, %v1331_v4  ;;  %v6458_v31 = vand.u32 4294901760, %v1278_v11  ;;  %5470 = vmatprep.subr.mxu0 %v1331_v4  ;;  %v2465_v61 = vsub.f32 %v2333_v48, %v6545_v55 }
 0x279   :  { %5471 = vmatpush3.msra.mxu0 %v1331_v4 }
 0x27a   :  { %v1426_v33 = vsub.f32 %v1278_v11, %v6458_v31  ;;  %5472 = vmatprep.subr.mxu0 %v6458_v31  ;;  %v1420_v36 = vand.u32 4294901760, %v1419_v12  ;;  %v2460_v11 = vsub.f32 %v2458_v57, %v2459_v63 }
 0x27b   :  { %5473 = vmatpush3.msra.mxu0 %v6458_v31 }
 0x27c   :  { %5475 = vmatmul.mubr.f32.vlgmr.msra.gmra.mxu0 %v1383_v32  ;;  %5484 = vmatprep.subr.mxu0 %v1419_v12  ;;  %v1421_v40 = vsub.f32 %v1419_v12, %v1420_v36  ;;  %v1427_v45 = vand.u32 4294901760, %v1426_v33  ;;  %v2461_v32 = vand.u32 4294901760, %v2460_v11 }
 0x27d   :  { %5485 = vmatpush3.msra.mxu0 %v1419_v12  ;;  %5488 = vmatprep.mubr.f32.mxu0 %v6436_v7  ;;  %v1935_v7 = vsub.f32 %v1933_v19, %v1934_v26 }
 0x27e   :  { %5486 = vmatprep.subr.mxu0 %v1426_v33  ;;  %v1422_v54 = vand.u32 4294901760, %v1421_v40  ;;  %v1428_v62 = vsub.f32 %v1426_v33, %v1427_v45 }
 0x27f   :  { %5487 = vmatpush3.msra.mxu0 %v1426_v33  ;;  %v1936_v35 = vand.u32 4294901760, %v1935_v7 }
 0x280   :  { %5477 = vmatprep.subr.mxu1 %v1422_v54  ;;  %5489 = vmatmul.mubr.f32.vlgmr.msra.gmra.mxu0 %v6452_v43  ;;  %v1429_v25 = vand.u32 4294901760, %v1428_v62 }
 0x281   :  { %5498 = vmatprep.subr.mxu0 %v1420_v36  ;;  %5478 = vmatpush3.msra.mxu1 %v1422_v54 }
 0x282   :  { %5499 = vmatpush3.msra.mxu0 %v1420_v36  ;;  %5479 = vmatprep.subr.mxu1 %v1429_v25 }
 0x283   :  { %5500 = vmatprep.subr.mxu0 %v1427_v45  ;;  %5480 = vmatpush3.msra.mxu1 %v1429_v25 }
 0x284   :  { %5501 = vmatpush3.msra.mxu0 %v1427_v45  ;;  %5502 = vmatprep.mubr.msk.f32.mxu0 %vm1295_vm4, %v6430_v58 }
 0x285   :  { %5482 = vmatmul.mubr.msk.f32.vlgmr.msra.gmra.mxu1 %vm1295_vm4, %v6448_v21  ;;  %5491 = vmatprep.subr.mxu1 %v1331_v4 }
 0x286   :  { %5503 = vmatmul.mubr.msk.f32.vlgmr.msra.gmra.mxu0 %vm1295_vm4, %v6448_v21  ;;  %5512 = vmatprep.subr.mxu0 %v6467_v46 }
 0x287   :  { %5492 = vmatpush3.msra.mxu1 %v1331_v4  ;;  %5513 = vmatpush3.msra.mxu0 %v6467_v46 }
 0x288   :  { %5520 = vmatprep.mubr.f32.mxu0 %v6389_v37  ;;  %5493 = vmatprep.subr.mxu1 %v6458_v31 }
 0x289   :  { %5514 = vmatprep.subr.mxu0 %v6476_v27  ;;  %5494 = vmatpush3.msra.mxu1 %v6458_v31 }
 0x28a   :  { %5495 = vmatprep.mubr.f32.mxu1 %v1371_v8  ;;  %5515 = vmatpush3.msra.mxu0 %v6476_v27  ;;  %v1929_v8 = vand.u32 4294901760, %v1928_v28 }
 0x28b   :  { %5496 = vmatmul.mubr.f32.vlgmr.msra.gmra.mxu1 %v1381_v51  ;;  %5505 = vmatprep.subr.mxu1 %v1331_v4  ;;  %v2332_v51 = vld [vmem:[%s6864_s2 + $0x40] sm:$0xff] }
 0x28c   :  { %5516 = vmatprep.subr.mxu0 %v6482_v9  ;;  %5506 = vmatpush3.msra.mxu1 %v1331_v4  ;;  %v6549_v56 = vand.u32 4294901760, %v2332_v51  ;;  %v2466_v4 = vand.u32 4294901760, %v2465_v61 }
 0x28d   :  { %5517 = vmatpush3.msra.mxu0 %v6482_v9  ;;  %5507 = vmatprep.subr.mxu1 %v6458_v31 }
 0x28e   :  { %5518 = vmatprep.subr.mxu0 %v6486_v13  ;;  %5508 = vmatpush3.msra.mxu1 %v6458_v31  ;;  %v2472_v1 = vsub.f32 %v2332_v51, %v6549_v56  ;;  %v2467_v31 = vsub.f32 %v2465_v61, %v2466_v4 }
 0x28f   :  { %5509 = vmatprep.mubr.msk.f32.mxu1 %vm1295_vm4, %v6430_v58  ;;  %5519 = vmatpush3.msra.mxu0 %v6486_v13  ;;  %v1943_v58 = vand.u32 4294901760, %v1942_v34 }
 0x290   :  { %5510 = vmatmul.mubr.msk.f32.vlgmr.msra.gmra.mxu1 %vm1295_vm4, %v6448_v21  ;;  %5521 = vmatmul.mubr.f32.vlgmr.msra.gmra.mxu0 %v6394_v38  ;;  %v2335_v21 = vld [vmem:[%s6864_s2 + $0x58] sm:$0xff]  ;;  %v2473_v12 = vand.u32 4294901760, %v2472_v1  ;;  %v2468_v36 = vand.u32 4294901760, %v2467_v31 }
 0x291   :  { %5523 = vmatprep.subr.mxu1 %v1922_v30  ;;  %5534 = vmatprep.subr.mxu0 %v1919_v2  ;;  %v6525_v43 = vand.u32 4294901760, %v2335_v21 }
 0x292   :  { %5524 = vmatpush3.msra.mxu1 %v1922_v30  ;;  %5531 = vmatprep.mubr.f32.mxu1 %v6366_v5  ;;  %v2474_v33 = vsub.f32 %v2472_v1, %v2473_v12 }
 0x293   :  { %5535 = vmatpush3.msra.mxu0 %v1919_v2  ;;  %5542 = vmatprep.mubr.f32.mxu0 %v6369_v0  ;;  %v2451_v52 = vsub.f32 %v2335_v21, %v6525_v43 }
 0x294   :  { %5525 = vmatprep.subr.mxu1 %v1929_v8  ;;  %5536 = vmatprep.subr.mxu0 %v1926_v15  ;;  %v2475_v39 = vand.u32 4294901760, %v2474_v33 }
 0x295   :  { %5526 = vmatpush3.msra.mxu1 %v1929_v8  ;;  %5537 = vmatpush3.msra.mxu0 %v1926_v15  ;;  %v2452_v60 = vand.u32 4294901760, %v2451_v52 }
 0x296   :  { %5527 = vmatprep.subr.mxu1 %v1936_v35  ;;  %5538 = vmatprep.subr.mxu0 %v1933_v19 }
 0x297   :  { %5528 = vmatpush3.msra.mxu1 %v1936_v35  ;;  %5539 = vmatpush3.msra.mxu0 %v1933_v19  ;;  %v2453_v3 = vsub.f32 %v2451_v52, %v2452_v60 }
 0x298   :  { %5529 = vmatprep.subr.mxu1 %v1943_v58  ;;  %5540 = vmatprep.subr.mxu0 %v1940_v22 }
 0x299   :  { %5530 = vmatpush3.msra.mxu1 %v1943_v58  ;;  %5541 = vmatpush3.msra.mxu0 %v1940_v22 }
 0x29a   :  { %5532 = vmatmul.mubr.f32.vlgmr.msra.gmra.mxu1 %v6361_v17  ;;  %5543 = vmatmul.mubr.f32.vlgmr.msra.gmra.mxu0 %v6364_v59 }
 0x29b   :  { %5545 = vmatprep.subr.mxu1 %v6467_v46  ;;  %5556 = vmatprep.subr.mxu0 %v1920_v18 }
 0x29c   :  { %5546 = vmatpush3.msra.mxu1 %v6467_v46  ;;  %5553 = vmatprep.mubr.f32.mxu1 %v6378_v24 }
 0x29d   :  { %5557 = vmatpush3.msra.mxu0 %v1920_v18  ;;  %5564 = vmatprep.mubr.f32.mxu0 %v6366_v5 }
 0x29e   :  { %5547 = vmatprep.subr.mxu1 %v6476_v27  ;;  %5558 = vmatprep.subr.mxu0 %v1927_v20 }
 0x29f   :  { %5548 = vmatpush3.msra.mxu1 %v6476_v27  ;;  %5559 = vmatpush3.msra.mxu0 %v1927_v20 }
 0x2a0   :  { %5549 = vmatprep.subr.mxu1 %v6482_v9  ;;  %5560 = vmatprep.subr.mxu0 %v1934_v26 }
 0x2a1   :  { %5550 = vmatpush3.msra.mxu1 %v6482_v9  ;;  %5561 = vmatpush3.msra.mxu0 %v1934_v26 }
 0x2a2   :  { %5551 = vmatprep.subr.mxu1 %v6486_v13  ;;  %5562 = vmatprep.subr.mxu0 %v1941_v29 }
 0x2a3   :  { %5552 = vmatpush3.msra.mxu1 %v6486_v13  ;;  %5563 = vmatpush3.msra.mxu0 %v1941_v29 }
 0x2a4   :  { %5554 = vmatmul.mubr.f32.vlgmr.msra.gmra.mxu1 %v6373_v10  ;;  %5565 = vmatmul.mubr.f32.vlgmr.msra.gmra.mxu0 %v6361_v17 }
 0x2a5   :  { %5567 = vmatprep.subr.mxu1 %v6467_v46  ;;  %5578 = vmatprep.subr.mxu0 %v6525_v43 }
 0x2a6   :  { %5568 = vmatpush3.msra.mxu1 %v6467_v46  ;;  %5575 = vmatprep.mubr.f32.mxu1 %v6366_v5 }
 0x2a7   :  { %5579 = vmatpush3.msra.mxu0 %v6525_v43  ;;  %5586 = vmatprep.mubr.f32.mxu0 %v6389_v37  ;;  %v2454_v37 = vand.u32 4294901760, %v2453_v3 }
 0x2a8   :  { %5569 = vmatprep.subr.mxu1 %v6476_v27  ;;  %5580 = vmatprep.subr.mxu0 %v6537_v50 }
 0x2a9   :  { %5570 = vmatpush3.msra.mxu1 %v6476_v27  ;;  %5581 = vmatpush3.msra.mxu0 %v6537_v50 }
 0x2aa   :  { %5571 = vmatprep.subr.mxu1 %v6482_v9  ;;  %5582 = vmatprep.subr.mxu0 %v6545_v55 }
 0x2ab   :  { %5572 = vmatpush3.msra.mxu1 %v6482_v9  ;;  %5583 = vmatpush3.msra.mxu0 %v6545_v55 }
 0x2ac   :  { %5573 = vmatprep.subr.mxu1 %v6486_v13  ;;  %5584 = vmatprep.subr.mxu0 %v6549_v56 }
 0x2ad   :  { %5574 = vmatpush3.msra.mxu1 %v6486_v13  ;;  %5585 = vmatpush3.msra.mxu0 %v6549_v56 }
 0x2ae   :  { %5576 = vmatmul.mubr.f32.vlgmr.msra.gmra.mxu1 %v6361_v17  ;;  %5587 = vmatmul.mubr.f32.vlgmr.msra.gmra.mxu0 %v6394_v38 }
 0x2af   :  { %5589 = vmatprep.subr.mxu1 %v2454_v37  ;;  %5600 = vmatprep.subr.mxu0 %v2451_v52 }
 0x2b0   :  { %5590 = vmatpush3.msra.mxu1 %v2454_v37  ;;  %5597 = vmatprep.mubr.f32.mxu1 %v6366_v5  ;;  %v2865_v37 = vadd.s32 2, %v6443_v14 }
 0x2b1   :  { %5601 = vmatpush3.msra.mxu0 %v2451_v52  ;;  %5608 = vmatprep.mubr.f32.mxu0 %v6369_v0 }
 0x2b2   :  { %5591 = vmatprep.subr.mxu1 %v2461_v32  ;;  %5602 = vmatprep.subr.mxu0 %v2458_v57  ;;  %vm2867_vm7 = vcmp.eq.s32.totalorder %v6126_v42, %v2865_v37 }
 0x2b3   :  { %5592 = vmatpush3.msra.mxu1 %v2461_v32  ;;  %5603 = vmatpush3.msra.mxu0 %v2458_v57  ;;  %v6625_v33 = vsel %vm2867_vm7, 1.0, %v5844_v49 }
 0x2b4   :  { %5593 = vmatprep.subr.mxu1 %v2468_v36  ;;  %5604 = vmatprep.subr.mxu0 %v2465_v61 }
 0x2b5   :  { %5594 = vmatpush3.msra.mxu1 %v2468_v36  ;;  %5605 = vmatpush3.msra.mxu0 %v2465_v61 }
 0x2b6   :  { %5595 = vmatprep.subr.mxu1 %v2475_v39  ;;  %5606 = vmatprep.subr.mxu0 %v2472_v1 }
 0x2b7   :  { %5596 = vmatpush3.msra.mxu1 %v2475_v39  ;;  %5607 = vmatpush3.msra.mxu0 %v2472_v1 }
 0x2b8   :  { %5598 = vmatmul.mubr.f32.vlgmr.msra.gmra.mxu1 %v6361_v17  ;;  %5609 = vmatmul.mubr.f32.vlgmr.msra.gmra.mxu0 %v6364_v59  ;;  %v2864_v59 = vadd.s32 2, %v5888_v6 }
 0x2b9   :  { %5611 = vmatprep.subr.mxu1 %v6525_v43  ;;  %5622 = vmatprep.subr.mxu0 %v2452_v60 }
 0x2ba   :  { %5612 = vmatpush3.msra.mxu1 %v6525_v43  ;;  %5619 = vmatprep.mubr.f32.mxu1 %v6378_v24  ;;  %vm2866_vm6 = vcmp.eq.s32.totalorder %v6126_v42, %v2864_v59 }
 0x2bb   :  { %5623 = vmatpush3.msra.mxu0 %v2452_v60  ;;  %5630 = vmatprep.mubr.f32.mxu0 %v6366_v5 }
 0x2bc   :  { %5613 = vmatprep.subr.mxu1 %v6537_v50  ;;  %5624 = vmatprep.subr.mxu0 %v2459_v63 }
 0x2bd   :  { %5614 = vmatpush3.msra.mxu1 %v6537_v50  ;;  %5625 = vmatpush3.msra.mxu0 %v2459_v63 }
 0x2be   :  { %5615 = vmatprep.subr.mxu1 %v6545_v55  ;;  %5626 = vmatprep.subr.mxu0 %v2466_v4 }
 0x2bf   :  { %5616 = vmatpush3.msra.mxu1 %v6545_v55  ;;  %5627 = vmatpush3.msra.mxu0 %v2466_v4 }
 0x2c0   :  { %5617 = vmatprep.subr.mxu1 %v6549_v56  ;;  %5628 = vmatprep.subr.mxu0 %v2473_v12 }
 0x2c1   :  { %5618 = vmatpush3.msra.mxu1 %v6549_v56  ;;  %5629 = vmatpush3.msra.mxu0 %v2473_v12 }
 0x2c2   :  { %5620 = vmatmul.mubr.f32.vlgmr.msra.gmra.mxu1 %v6373_v10  ;;  %5631 = vmatmul.mubr.f32.vlgmr.msra.gmra.mxu0 %v6361_v17 }
 0x2c3   :  { %5633 = vmatprep.subr.mxu1 %v6525_v43  ;;  %5641 = vmatprep.mubr.f32.mxu1 %v6366_v5  ;;  %v6606_v5 = vsel %vm2866_vm6, 1.0, %v5844_v49 }
 0x2c4   :  { %5634 = vmatpush3.msra.mxu1 %v6525_v43  ;;  %v2873_v0 = vsel %vm1295_vm4, %v6606_v5, 0 }
 0x2c5   :  { %5635 = vmatprep.subr.mxu1 %v6537_v50  ;;  %v6612_v10 = vsub.f32 %v2873_v0, %v2873_v0 }
 0x2c6   :  { %5636 = vmatpush3.msra.mxu1 %v6537_v50 }
 0x2c7   :  { %5637 = vmatprep.subr.mxu1 %v6545_v55  ;;  %v2947_v24 = vand.u32 4294901760, %v6612_v10 }
 0x2c8   :  { %5638 = vmatpush3.msra.mxu1 %v6545_v55 }
 0x2c9   :  { %5639 = vmatprep.subr.mxu1 %v6549_v56 }
 0x2ca   :  { %5640 = vmatpush3.msra.mxu1 %v6549_v56 }
 0x2cb   :  { %5642 = vmatmul.mubr.f32.vlgmr.msra.gmra.mxu1 %v6361_v17  ;;  %v2948_v17 = vsub.f32 %v6612_v10, %v2947_v24 }
 0x2cc   :  { %5655 = vmatprep.mubr.msk.f32.mxu1 %vm1295_vm4, %v6606_v5 }
 0x2cd   :  { %v2949_v38 = vand.u32 4294901760, %v2948_v17  ;;  %v2876_v17 = vsel %vm1295_vm4, %v6625_v33, 0 }
 0x2cf   :  { %5648 = vmatprep.mubr.f32.mxu0 %v2949_v38 }
 0x33c   :  { %v5476_v40 = vpop.f32.mrf.mxu0 }
 0x33e   :  { %v1375_v45 = vpop.f32.mrf.mxu0 }
 0x340   :  { %v5490_v46 = vpop.f32.mrf.mxu0 }
 0x342   :  { %v1548_v53 = vpop.f32.mrf.mxu0 }
 0x345   :  { %v5483_v54 = vpop.f32.mrf.mxu1 }
 0x346   :  { %v1473_v62 = vadd.f32 %v5483_v54, %v5476_v40  ;;  %v5504_v41 = vpop.f32.mrf.mxu0 }
 0x347   :  { %v1466_v47 = vpop.f32.mrf.mxu1 }
 0x348   :  { %v1556_v25 = vadd.f32 %v5490_v46, %v1473_v62  ;;  %v1467_v27 = vadd.f32 %v1466_v47, %v1375_v45  ;;  %v1715_v15 = vpop.f32.mrf.mxu0  ;;  %v2956_v46 = vsub.f32 %v2876_v17, %v2876_v17 }
 0x34a   :  { %v1549_v2 = vadd.f32 %v1548_v53, %v1467_v27 }
 0x34b   :  { %v5497_v9 = vpop.f32.mrf.mxu1 }
 0x34c   :  { %v1639_v13 = vadd.f32 %v5497_v9, %v1556_v25  ;;  %v2957_v25 = vand.u32 4294901760, %v2956_v46 }
 0x34d   :  { %v1630_v18 = vpop.f32.mrf.mxu1 }
 0x34e   :  { %v1722_v19 = vadd.f32 %v5504_v41, %v1639_v13  ;;  %v1631_v20 = vadd.f32 %v1630_v18, %v1549_v2 }
 0x350   :  { %v1716_v22 = vadd.f32 %v1715_v15, %v1631_v20  ;;  %v5511_v23 = vpop.f32.mrf.mxu1  ;;  %v5522_v26 = vpop.f32.mrf.mxu0  ;;  %v2958_v15 = vsub.f32 %v2956_v46, %v2957_v25 }
 0x351   :  { %v1801_v28 = vadd.f32 %v5511_v23, %v1722_v19 }
 0x352   :  { %v1794_v29 = vpop.f32.mrf.mxu1  ;;  %v1879_v8 = vpop.f32.mrf.mxu0 }
 0x353   :  { %v1890_v30 = vadd.f32 %v5522_v26, %v1801_v28  ;;  %v1795_v7 = vadd.f32 %v1794_v29, %v1716_v22  ;;  %v2959_v26 = vand.u32 4294901760, %v2958_v15 }
 0x355   :  { %v1880_v34 = vadd.f32 %v1879_v8, %v1795_v7 }
 0x35a   :  { %v5533_v35 = vpop.f32.mrf.mxu1  ;;  %v5544_v58 = vpop.f32.mrf.mxu0 }
 0x35b   :  { %v1987_v21 = vadd.f32 %v5533_v35, %v1890_v30 }
 0x35c   :  { %v1980_v43 = vpop.f32.mrf.mxu1  ;;  %v2066_v50 = vpop.f32.mrf.mxu0 }
 0x35d   :  { %v2074_v44 = vadd.f32 %v5544_v58, %v1987_v21  ;;  %v1981_v48 = vadd.f32 %v1980_v43, %v1880_v34  ;;  %v3414_v58 = vld [vmem:[%s6864_s2 + $0x60] sm:$0xff] }
 0x35f   :  { %v2067_v51 = vadd.f32 %v2066_v50, %v1981_v48 }
 0x364   :  { %v5555_v52 = vpop.f32.mrf.mxu1  ;;  %v5566_v55 = vpop.f32.mrf.mxu0 }
 0x365   :  { %v2159_v56 = vadd.f32 %v5555_v52, %v2074_v44 }
 0x366   :  { %v2150_v57 = vpop.f32.mrf.mxu1  ;;  %v2241_v63 = vpop.f32.mrf.mxu0 }
 0x367   :  { %v2248_v60 = vadd.f32 %v5566_v55, %v2159_v56  ;;  %v2151_v61 = vadd.f32 %v2150_v57, %v2067_v51 }
 0x369   :  { %v2242_v1 = vadd.f32 %v2241_v63, %v2151_v61  ;;  %v3383_v61 = vld [vmem:[%s6864_s2 + $0x81] sm:$0x1] }
 0x36a   :  { %v5812_v37 = vtrunc.f32 %v3383_v61 }
 0x36e   :  { %v5577_v3 = vpop.f32.mrf.mxu1  ;;  %v5588_v31 = vpop.f32.mrf.mxu0 }
 0x36f   :  { %v6618_v4 = vadd.f32 %v5577_v3, %v2248_v60 }
 0x370   :  { %v2322_v11 = vpop.f32.mrf.mxu1  ;;  %v2411_v36 = vpop.f32.mrf.mxu0 }
 0x371   :  { %v6620_v12 = vadd.f32 %v2322_v11, %v2242_v1 }
 0x378   :  { %v5599_v32 = vpop.f32.mrf.mxu1  ;;  %v5610_v0 = vpop.f32.mrf.mxu0 }
 0x379   :  { %v2519_v59 = vadd.f32 %v5599_v32, %v5588_v31 }
 0x37a   :  { %v2512_v39 = vpop.f32.mrf.mxu1  ;;  %v2598_v53 = vpop.f32.mrf.mxu0 }
 0x37b   :  { %v2513_v38 = vadd.f32 %v2512_v39, %v2411_v36  ;;  %v2606_v45 = vadd.f32 %v5610_v0, %v2519_v59  ;;  %v5813_v0 = vcvt.f32.s32 %v5812_v37 }
 0x37d   :  { %v2599_v54 = vadd.f32 %v2598_v53, %v2513_v38 }
 0x382   :  { %v5621_v40 = vpop.f32.mrf.mxu1  ;;  %v5632_v47 = vpop.f32.mrf.mxu0 }
 0x383   :  { %v2691_v62 = vadd.f32 %v5621_v40, %v2606_v45 }
 0x384   :  { %v2682_v14 = vpop.f32.mrf.mxu1  ;;  %v2773_v41 = vpop.f32.mrf.mxu0 }
 0x385   :  { %v2683_v42 = vadd.f32 %v2682_v14, %v2599_v54  ;;  %v2780_v27 = vadd.f32 %v5632_v47, %v2691_v62  ;;  %v3396_v54 = vrot.slane %v5813_v0, %v23_v16  ;;  %v4872_v62 = vld [vmem:[%s6864_s2 + $0x80] ss:$0 sm:$0xff] }
 0x387   :  { %v2774_v9 = vadd.f32 %v2773_v41, %v2683_v42  ;;  %vm3397_vm9 = vcmp.lt.s32.totalorder %v5888_v6, %v3396_v54 }
 0x38b   :  { %v5643_v2 = vpop.f32.mrf.mxu1 }
 0x38c   :  { %v2861_v13 = vadd.f32 %v5643_v2, %v2780_v27 }
 0x38d   :  { %v2854_v18 = vpop.f32.mrf.mxu1 }
 0x38e   :  { %v2907_v19 = vand.u32 4294901760, %v2861_v13  ;;  %v2855_v20 = vadd.f32 %v2854_v18, %v2774_v9 }
 0x390   :  { %v2995_v22 = vsub.f32 %v2861_v13, %v2907_v19  ;;  %v2910_v23 = vand.u32 4294901760, %v2855_v20  ;;  %5644 = vmatprep.subr.mxu0 %v2907_v19 }
 0x391   :  { %5645 = vmatpush3.msra.mxu0 %v2907_v19 }
 0x392   :  { %v3002_v28 = vsub.f32 %v2855_v20, %v2910_v23  ;;  %5646 = vmatprep.subr.mxu0 %v2910_v23  ;;  %v2996_v29 = vand.u32 4294901760, %v2995_v22 }
 0x393   :  { %5647 = vmatpush3.msra.mxu0 %v2910_v23 }
 0x394   :  { %5658 = vmatprep.subr.mxu0 %v2995_v22  ;;  %5649 = vmatmul.mubr.f32.vlgmr.msra.gmra.mxu0 %v2959_v26  ;;  %v2997_v30 = vsub.f32 %v2995_v22, %v2996_v29  ;;  %v3003_v7 = vand.u32 4294901760, %v3002_v28 }
 0x395   :  { %5659 = vmatpush3.msra.mxu0 %v2995_v22  ;;  %5662 = vmatprep.mubr.f32.mxu0 %v6612_v10  ;;  %v3415_v10 = vld [vmem:[%s6864_s2 + $0x68] sm:$0xff] }
 0x396   :  { %5660 = vmatprep.subr.mxu0 %v3002_v28  ;;  %v2998_v8 = vand.u32 4294901760, %v2997_v30  ;;  %v3004_v34 = vsub.f32 %v3002_v28, %v3003_v7 }
 0x397   :  { %5661 = vmatpush3.msra.mxu0 %v3002_v28 }
 0x398   :  { %5651 = vmatprep.subr.mxu1 %v2998_v8  ;;  %5672 = vmatprep.subr.mxu0 %v2996_v29  ;;  %v3005_v35 = vand.u32 4294901760, %v3004_v34 }
 0x399   :  { %5652 = vmatpush3.msra.mxu1 %v2998_v8  ;;  %5663 = vmatmul.mubr.f32.vlgmr.msra.gmra.mxu0 %v2956_v46 }
 0x39a   :  { %5673 = vmatpush3.msra.mxu0 %v2996_v29  ;;  %5653 = vmatprep.subr.mxu1 %v3005_v35  ;;  %v3416_v29 = vld [vmem:[%s6864_s2 + $0x70] sm:$0xff] }
 0x39b   :  { %5674 = vmatprep.subr.mxu0 %v3003_v7  ;;  %5654 = vmatpush3.msra.mxu1 %v3005_v35  ;;  %v6697_v35 = vand.u32 4294901760, %v3416_v29 }
 0x39c   :  { %5675 = vmatpush3.msra.mxu0 %v3003_v7  ;;  %5656 = vmatmul.mubr.msk.f32.vlgmr.msra.gmra.mxu1 %vm1295_vm4, %v6625_v33 }
 0x39d   :  { %5665 = vmatprep.subr.mxu1 %v2907_v19  ;;  %5669 = vmatprep.mubr.f32.mxu1 %v2947_v24  ;;  %v6647_v24 = vand.u32 4294901760, %v3415_v10 }
 0x39e   :  { %5666 = vmatpush3.msra.mxu1 %v2907_v19  ;;  %5676 = vmatprep.mubr.msk.f32.mxu0 %vm1295_vm4, %v6606_v5 }
 0x39f   :  { %5667 = vmatprep.subr.mxu1 %v2910_v23  ;;  %5677 = vmatmul.mubr.msk.f32.vlgmr.msra.gmra.mxu0 %vm1295_vm4, %v6625_v33  ;;  %v6653_v21 = vsub.f32 %v3415_v10, %v6647_v24 }
 0x3a0   :  { %5668 = vmatpush3.msra.mxu1 %v2910_v23  ;;  %5686 = vmatprep.subr.mxu0 %v5844_v49 }
 0x3a1   :  { %5670 = vmatmul.mubr.f32.vlgmr.msra.gmra.mxu1 %v2957_v25  ;;  %5679 = vmatprep.subr.mxu1 %v2907_v19  ;;  %v3538_v43 = vand.u32 4294901760, %v6653_v21 }
 0x3a2   :  { %5680 = vmatpush3.msra.mxu1 %v2907_v19  ;;  %5683 = vmatprep.mubr.msk.f32.mxu1 %vm1295_vm4, %v6606_v5  ;;  %v6655_v5 = vand.u32 4294901760, %v3414_v58 }
 0x3a3   :  { %5681 = vmatprep.subr.mxu1 %v2910_v23  ;;  %5687 = vmatpush3.msra.mxu0 %v6647_v24  ;;  %v3539_v48 = vsub.f32 %v6653_v21, %v3538_v43 }
 0x3a4   :  { %5682 = vmatpush3.msra.mxu1 %v2910_v23  ;;  %5688 = vmatprep.subr.mxu0 %v5844_v49  ;;  %v6661_v44 = vsub.f32 %v3414_v58, %v6655_v5 }
 0x3a5   :  { %5684 = vmatmul.mubr.msk.f32.vlgmr.msra.gmra.mxu1 %vm1295_vm4, %v6625_v33  ;;  %5693 = vmatprep.subr.mxu1 %v5844_v49  ;;  %v3540_v51 = vand.u32 4294901760, %v3539_v48 }
 0x3a6   :  { %5689 = vmatpush3.msra.mxu0 %v6655_v5  ;;  %v3545_v50 = vand.u32 4294901760, %v6661_v44  ;;  %5697 = vmatprep.mubr.msk.f32.mxu1 %vm5846_vm8, %v5844_v49 }
 0x3a7   :  { %5700 = vmatprep.subr.mxu0 %v5844_v49  ;;  %5694 = vmatpush3.msra.mxu1 %v3540_v51 }
 0x3a8   :  { %v3546_v52 = vsub.f32 %v6661_v44, %v3545_v50  ;;  %5695 = vmatprep.subr.mxu1 %v5844_v49  ;;  %5690 = vmatprep.mubr.msk.f32.mxu0 %vm5846_vm8, %v5844_v49 }
 0x3aa   :  { %v3547_v55 = vand.u32 4294901760, %v3546_v52  ;;  %v6704_v52 = vsub.f32 %v3416_v29, %v6697_v35 }
 0x3ac   :  { %5696 = vmatpush3.msra.mxu1 %v3547_v55  ;;  %v4009_v61 = vand.u32 4294901760, %v6704_v52 }
 0x3ad   :  { %5707 = vmatprep.subr.mxu1 %v5844_v49 }
 0x454   :  { %v5650_v56 = vpop.f32.mrf.mxu0 }
 0x456   :  { %v2951_v57 = vpop.f32.mrf.mxu0 }
 0x459   :  { %v5664_v60 = vpop.f32.mrf.mxu0 }
 0x45b   :  { %v3124_v3 = vpop.f32.mrf.mxu0 }
 0x45c   :  { %v5657_v63 = vpop.f32.mrf.mxu1 }
 0x45d   :  { %v3049_v1 = vadd.f32 %v5657_v63, %v5650_v56 }
 0x45e   :  { %v3042_v11 = vpop.f32.mrf.mxu1 }
 0x45f   :  { %v3132_v31 = vadd.f32 %v5664_v60, %v3049_v1  ;;  %v3043_v32 = vadd.f32 %v3042_v11, %v2951_v57  ;;  %v5678_v39 = vpop.f32.mrf.mxu0  ;;  %v4010_v11 = vsub.f32 %v6704_v52, %v4009_v61 }
 0x461   :  { %v3125_v33 = vadd.f32 %v3124_v3, %v3043_v32  ;;  %v5671_v36 = vpop.f32.mrf.mxu1  ;;  %v3291_v45 = vpop.f32.mrf.mxu0  ;;  %v4011_v32 = vand.u32 4294901760, %v4010_v11 }
 0x462   :  { %v3215_v59 = vadd.f32 %v5671_v36, %v3132_v31 }
 0x463   :  { %v3206_v17 = vpop.f32.mrf.mxu1 }
 0x464   :  { %v3298_v38 = vadd.f32 %v5678_v39, %v3215_v59  ;;  %v3207_v40 = vadd.f32 %v3206_v17, %v3125_v33 }
 0x465   :  { %v5685_v46 = vpop.f32.mrf.mxu1 }
 0x466   :  { %v3292_v53 = vadd.f32 %v3291_v45, %v3207_v40  ;;  %v3377_v14 = vadd.f32 %v5685_v46, %v3298_v38 }
 0x467   :  { %v3370_v47 = vpop.f32.mrf.mxu1 }
 0x468   :  { %v3381_v42 = vadd.f32 %v3377_v14, %v6618_v4  ;;  %v3371_v25 = vadd.f32 %v3370_v47, %v3292_v53 }
 0x46a   :  { %v3390_v27 = vadd.f32 %v4872_v62, %v3381_v42  ;;  %v3380_v41 = vadd.f32 %v3371_v25, %v6620_v12  ;;  %v3417_v12 = vld [vmem:[%s6864_s2 + $0x78] sm:$0xff] }
 0x46b   :  { %v3923_v8 = vand.u32 4294901760, %v3417_v12 }
 0x46c   :  { %v3392_v2 = vmax.f32 %v3390_v27, 0.0  ;;  %v3389_v9 = vadd.f32 %v4872_v62, %v3380_v41 }
 0x46d   :  { %v6699_v48 = vsub.f32 %v3417_v12, %v3923_v8 }
 0x46e   :  { %v3399_v13 = vsel %vm3397_vm9, %v3392_v2, 0.0  ;;  %v3391_v15 = vmax.f32 %v3389_v9, 0.0 }
 0x46f   :  { %v3407_v18 = vsel %vm1295_vm4, %v3399_v13, -inf  ;;  %v4002_v57 = vand.u32 4294901760, %v6699_v48 }
 0x470   :  { %v3408_v16 = vrot.slane %v3407_v18, 4  ;;  %v3398_v19 = vsel %vm3397_vm9, %v3391_v15, 0.0  ;;  %v4874_v15 = vld [vmem:[%s6864_s2 + $0x83] ss:$0 sm:$0xff] }
 0x471   :  { %v3400_v20 = vsel %vm1295_vm4, %v3398_v19, -inf  ;;  %v4003_v1 = vsub.f32 %v6699_v48, %v4002_v57 }
 0x472   :  { %v3409_v22 = vmax.f32 %v3407_v18, %v3408_v16  ;;  %v3401_v23 = vrot.slane %v3400_v20, 4 }
 0x473   :  { %v4004_v31 = vand.u32 4294901760, %v4003_v1 }
 0x474   :  { %v3410_v26 = vrot.slane %v3409_v22, 2  ;;  %v3402_v4 = vmax.f32 %v3400_v20, %v3401_v23 }
 0x476   :  { %v3411_v28 = vmax.f32 %v3409_v22, %v3410_v26  ;;  %v3403_v6 = vrot.slane %v3402_v4, 2 }
 0x478   :  { %v3412_v30 = vrot.slane %v3411_v28, 1  ;;  %v3404_v7 = vmax.f32 %v3402_v4, %v3403_v6 }
 0x47a   :  { %v3405_v34 = vrot.slane %v3404_v7, 1  ;;  %v3413_v10 = vmax.f32 %v3411_v28, %v3412_v30 }
 0x47c   :  { %v3406_v58 = vmax.f32 %v3404_v7, %v3405_v34 }
 0x47e   :  { %v6701_v51 = vsel %vm3426_vm10, %v3413_v10, %v3406_v58 }
 0x47f   :  { %v3428_v55 = vsel %vm1295_vm4, %v6701_v51, 0 }
 0x480   :  { %v6708_v56 = vand.u32 4294901760, %v3428_v55 }
 0x482   :  { %5698 = vmatmul.mubr.f32.vlgmr.msra.gmra.mxu1 %v6708_v56  ;;  %v6713_v60 = vsub.f32 %v3428_v55, %v6708_v56 }
 0x483   :  { %5708 = vmatpush3.msra.mxu1 %v6647_v24  ;;  %5711 = vmatprep.mubr.msk.f32.mxu1 %vm5846_vm8, %v5844_v49 }
 0x484   :  { %5709 = vmatprep.subr.mxu1 %v5844_v49  ;;  %v3499_v63 = vand.u32 4294901760, %v6713_v60 }
 0x485   :  { %5710 = vmatpush3.msra.mxu1 %v6655_v5 }
 0x486   :  { %5712 = vmatmul.mubr.f32.vlgmr.msra.gmra.mxu1 %v3499_v63  ;;  %5721 = vmatprep.subr.mxu1 %v5844_v49  ;;  %v3500_v3 = vsub.f32 %v6713_v60, %v3499_v63 }
 0x487   :  { %5722 = vmatpush3.msra.mxu1 %v6647_v24  ;;  %5725 = vmatprep.mubr.msk.f32.mxu1 %vm5846_vm8, %v5844_v49  ;;  %v4365_v24 = vld [vmem:[%s6865_s3 + $0x8] sm:$0xff] }
 0x488   :  { %5723 = vmatprep.subr.mxu1 %v5844_v49  ;;  %v3501_v37 = vand.u32 4294901760, %v3500_v3 }
 0x489   :  { %5724 = vmatpush3.msra.mxu1 %v6655_v5  ;;  %v6800_v5 = vand.u32 4294901760, %v4365_v24 }
 0x48a   :  { %5691 = vmatmul.mubr.f32.vlgmr.msra.gmra.mxu0 %v3501_v37  ;;  %5726 = vmatmul.mubr.f32.vlgmr.msra.gmra.mxu1 %v6708_v56 }
 0x48b   :  { %5735 = vmatprep.subr.mxu1 %v5844_v49  ;;  %5701 = vmatpush3.msra.mxu0 %v6653_v21  ;;  %v4364_v21 = vld [vmem:[%s6865_s3] sm:$0xff] }
 0x48c   :  { %5736 = vmatpush3.msra.mxu1 %v4004_v31  ;;  %5702 = vmatprep.subr.mxu0 %v5844_v49 }
 0x48d   :  { %5737 = vmatprep.subr.mxu1 %v5844_v49  ;;  %5703 = vmatpush3.msra.mxu0 %v6661_v44  ;;  %v6805_v44 = vsub.f32 %v4365_v24, %v6800_v5 }
 0x48e   :  { %5704 = vmatprep.mubr.msk.f32.mxu0 %vm5846_vm8, %v5844_v49  ;;  %5738 = vmatpush3.msra.mxu1 %v4011_v32 }
 0x48f   :  { %5739 = vmatprep.mubr.msk.f32.mxu1 %vm5846_vm8, %v5844_v49  ;;  %5705 = vmatmul.mubr.f32.vlgmr.msra.gmra.mxu0 %v6713_v60  ;;  %v4482_v33 = vand.u32 4294901760, %v6805_v44 }
 0x490   :  { %5714 = vmatprep.subr.mxu0 %v5844_v49  ;;  %5740 = vmatmul.mubr.f32.vlgmr.msra.gmra.mxu1 %v6708_v56 }
 0x491   :  { %5749 = vmatprep.subr.mxu1 %v5844_v49  ;;  %5715 = vmatpush3.msra.mxu0 %v3538_v43  ;;  %v6802_v43 = vand.u32 4294901760, %v4364_v21  ;;  %v4483_v39 = vsub.f32 %v6805_v44, %v4482_v33 }
 0x492   :  { %5750 = vmatpush3.msra.mxu1 %v3923_v8  ;;  %5716 = vmatprep.subr.mxu0 %v5844_v49 }
 0x493   :  { %5751 = vmatprep.subr.mxu1 %v5844_v49  ;;  %5717 = vmatpush3.msra.mxu0 %v3545_v50  ;;  %v6808_v50 = vsub.f32 %v4364_v21, %v6802_v43  ;;  %v4484_v0 = vand.u32 4294901760, %v4483_v39 }
 0x494   :  { %5718 = vmatprep.mubr.msk.f32.mxu0 %vm5846_vm8, %v5844_v49  ;;  %5752 = vmatpush3.msra.mxu1 %v6697_v35 }
 0x495   :  { %5753 = vmatprep.mubr.msk.f32.mxu1 %vm5846_vm8, %v5844_v49  ;;  %5719 = vmatmul.mubr.f32.vlgmr.msra.gmra.mxu0 %v6708_v56  ;;  %v4489_v36 = vand.u32 4294901760, %v6808_v50 }
 0x496   :  { %5728 = vmatprep.subr.mxu0 %v5844_v49  ;;  %5754 = vmatmul.mubr.f32.vlgmr.msra.gmra.mxu1 %v3499_v63 }
 0x497   :  { %5763 = vmatprep.subr.mxu1 %v5844_v49  ;;  %5729 = vmatpush3.msra.mxu0 %v3923_v8  ;;  %v4490_v59 = vsub.f32 %v6808_v50, %v4489_v36 }
 0x498   :  { %5764 = vmatpush3.msra.mxu1 %v3923_v8  ;;  %5730 = vmatprep.subr.mxu0 %v5844_v49 }
 0x499   :  { %5765 = vmatprep.subr.mxu1 %v5844_v49  ;;  %5731 = vmatpush3.msra.mxu0 %v6697_v35  ;;  %v4491_v17 = vand.u32 4294901760, %v4490_v59 }
 0x49a   :  { %5732 = vmatprep.mubr.msk.f32.mxu0 %vm5846_vm8, %v5844_v49  ;;  %5766 = vmatpush3.msra.mxu1 %v6697_v35  ;;  %v4873_v35 = vld [vmem:[%s6864_s2 + $0x82] ss:$0 sm:$0xff] }
 0x49b   :  { %5767 = vmatprep.mubr.msk.f32.mxu1 %vm5846_vm8, %v5844_v49  ;;  %5733 = vmatmul.mubr.f32.vlgmr.msra.gmra.mxu0 %v3501_v37 }
 0x49c   :  { %5742 = vmatprep.subr.mxu0 %v5844_v49  ;;  %5768 = vmatmul.mubr.f32.vlgmr.msra.gmra.mxu1 %v6708_v56 }
 0x49d   :  { %5743 = vmatpush3.msra.mxu0 %v6699_v48  ;;  %5746 = vmatprep.mubr.msk.f32.mxu0 %vm5846_vm8, %v5844_v49 }
 0x49e   :  { %5744 = vmatprep.subr.mxu0 %v5844_v49  ;;  %5777 = vmatprep.subr.mxu1 %v5844_v49 }
 0x49f   :  { %5745 = vmatpush3.msra.mxu0 %v6704_v52  ;;  %5781 = vmatprep.mubr.msk.f32.mxu1 %vm5846_vm8, %v5844_v49 }
 0x4a0   :  { %5747 = vmatmul.mubr.f32.vlgmr.msra.gmra.mxu0 %v6713_v60  ;;  %5756 = vmatprep.subr.mxu0 %v5844_v49 }
 0x4a1   :  { %5757 = vmatpush3.msra.mxu0 %v4002_v57  ;;  %5760 = vmatprep.mubr.msk.f32.mxu0 %vm5846_vm8, %v5844_v49 }
 0x4a2   :  { %5758 = vmatprep.subr.mxu0 %v5844_v49  ;;  %5778 = vmatpush3.msra.mxu1 %v4484_v0 }
 0x4a3   :  { %5759 = vmatpush3.msra.mxu0 %v4009_v61  ;;  %5779 = vmatprep.subr.mxu1 %v5844_v49 }
 0x4a4   :  { %5761 = vmatmul.mubr.f32.vlgmr.msra.gmra.mxu0 %v6708_v56  ;;  %5770 = vmatprep.subr.mxu0 %v5844_v49 }
 0x4a5   :  { %5774 = vmatprep.mubr.msk.f32.mxu0 %vm5846_vm8, %v5844_v49  ;;  %5771 = vmatpush3.msra.mxu0 %v6800_v5 }
 0x4a6   :  { %5772 = vmatprep.subr.mxu0 %v5844_v49  ;;  %5780 = vmatpush3.msra.mxu1 %v4491_v17  ;;  %v4875_v17 = vld [vmem:[%s6865_s3 + $0x10] ss:$0 sm:$0xff] }
 0x4a7   :  { %5773 = vmatpush3.msra.mxu0 %v6802_v43  ;;  %5791 = vmatprep.subr.mxu1 %v5844_v49 }
 0x4a8   :  { %5784 = vmatprep.subr.mxu0 %v5844_v49 }
 0x542   :  { %v3584_v38 = vpop.f32.mrf.mxu1 }
 0x544   :  { %v5699_v40 = vpop.f32.mrf.mxu1 }
 0x546   :  { %v3735_v45 = vpop.f32.mrf.mxu1 }
 0x548   :  { %v5713_v46 = vpop.f32.mrf.mxu1 }
 0x54a   :  { %v3503_v53 = vpop.f32.mrf.mxu0  ;;  %v3885_v14 = vpop.f32.mrf.mxu1 }
 0x54b   :  { %v3504_v10 = vadd.f32 %v4873_v35, %v3503_v53 }
 0x54c   :  { %v5692_v54 = vpop.f32.mrf.mxu0  ;;  %v5727_v62 = vpop.f32.mrf.mxu1 }
 0x54d   :  { %v3585_v58 = vadd.f32 %v3584_v38, %v3504_v10 }
 0x54f   :  { %v3660_v47 = vpop.f32.mrf.mxu0 }
 0x550   :  { %v4048_v42 = vpop.f32.mrf.mxu1  ;;  %v3661_v52 = vadd.f32 %v3660_v47, %v3585_v58 }
 0x551   :  { %v5706_v25 = vpop.f32.mrf.mxu0 }
 0x552   :  { %v5741_v27 = vpop.f32.mrf.mxu1  ;;  %v3736_v56 = vadd.f32 %v3735_v45, %v3661_v52 }
 0x555   :  { %v3812_v41 = vpop.f32.mrf.mxu0 }
 0x556   :  { %v4199_v2 = vpop.f32.mrf.mxu1  ;;  %v3813_v57 = vadd.f32 %v3812_v41, %v3736_v56 }
 0x557   :  { %v5720_v9 = vpop.f32.mrf.mxu0 }
 0x558   :  { %v5755_v13 = vpop.f32.mrf.mxu1  ;;  %v3886_v60 = vadd.f32 %v3885_v14, %v3813_v57 }
 0x55a   :  { %v3889_v63 = vmax.f32 %v3886_v60, 0.0 }
 0x55b   :  { %v3967_v18 = vpop.f32.mrf.mxu0 }
 0x55c   :  { %v3968_v16 = vadd.f32 %v4874_v15, %v3967_v18  ;;  %v4349_v19 = vpop.f32.mrf.mxu1 }
 0x55d   :  { %v5734_v20 = vpop.f32.mrf.mxu0 }
 0x55e   :  { %v5769_v22 = vpop.f32.mrf.mxu1  ;;  %v4049_v23 = vadd.f32 %v4048_v42, %v3968_v16 }
 0x560   :  { %v4124_v26 = vpop.f32.mrf.mxu0 }
 0x561   :  { %v4125_v4 = vadd.f32 %v4124_v26, %v4049_v23 }
 0x562   :  { %v5748_v12 = vpop.f32.mrf.mxu0 }
 0x563   :  { %v4200_v28 = vadd.f32 %v4199_v2, %v4125_v4 }
 0x564   :  { %v4276_v6 = vpop.f32.mrf.mxu0 }
 0x565   :  { %v4277_v29 = vadd.f32 %v4276_v6, %v4200_v28 }
 0x566   :  { %v5762_v30 = vpop.f32.mrf.mxu0 }
 0x567   :  { %v4350_v7 = vadd.f32 %v4349_v19, %v4277_v29 }
 0x569   :  { %v4353_v8 = vsub.f32 0.0, %v4350_v7 }
 0x56b   :  { %v4354_v34 = vmul.f32 1.442695, %v4353_v8 }
 0x56d   :  { %5818 = vpow2.f32 %v4354_v34 }
 0x57a   :  { %v5819_v48 = vpop.eup %5818 }
 0x57b   :  { %v4356_v55 = vadd.f32 1.0, %v5819_v48 }
 0x57d   :  { %5820 = vrcp.f32 %v4356_v55 }
 0x58a   :  { %v5821_v61 = vpop.eup %5820 }
 0x58b   :  { %v4360_v1 = vsub.f32 1.0, %v5821_v61  ;;  %v4359_v3 = vmul.f32 %v5821_v61, %v3889_v63 }
 0x58d   :  { %v4362_v11 = vmul.f32 %v4360_v1, %v6701_v51 }
 0x58f   :  { %v4363_v37 = vadd.f32 %v4362_v11, %v4359_v3 }
 0x591   :  { %v4372_v31 = vsel %vm1295_vm4, %v4363_v37, 0 }
 0x592   :  { %v4441_v32 = vand.u32 4294901760, %v4372_v31 }
 0x594   :  { %v4442_v24 = vsub.f32 %v4372_v31, %v4441_v32  ;;  %5782 = vmatmul.mubr.f32.vlgmr.msra.gmra.mxu1 %v4441_v32 }
 0x595   :  { %5792 = vmatpush3.msra.mxu1 %v6800_v5  ;;  %5795 = vmatprep.mubr.msk.f32.mxu1 %vm5846_vm8, %v5844_v49 }
 0x596   :  { %5793 = vmatprep.subr.mxu1 %v5844_v49  ;;  %v4443_v21 = vand.u32 4294901760, %v4442_v24 }
 0x597   :  { %5794 = vmatpush3.msra.mxu1 %v6802_v43 }
 0x598   :  { %5796 = vmatmul.mubr.f32.vlgmr.msra.gmra.mxu1 %v4443_v21  ;;  %5805 = vmatprep.subr.mxu1 %v5844_v49  ;;  %v4444_v51 = vsub.f32 %v4442_v24, %v4443_v21 }
 0x599   :  { %5806 = vmatpush3.msra.mxu1 %v6800_v5  ;;  %5809 = vmatprep.mubr.msk.f32.mxu1 %vm5846_vm8, %v5844_v49 }
 0x59a   :  { %5807 = vmatprep.subr.mxu1 %v5844_v49  ;;  %v4445_v39 = vand.u32 4294901760, %v4444_v51 }
 0x59b   :  { %5808 = vmatpush3.msra.mxu1 %v6802_v43 }
 0x59c   :  { %5775 = vmatmul.mubr.f32.vlgmr.msra.gmra.mxu0 %v4445_v39  ;;  %5810 = vmatmul.mubr.f32.vlgmr.msra.gmra.mxu1 %v4441_v32 }
 0x59d   :  { %5785 = vmatpush3.msra.mxu0 %v6805_v44  ;;  %5788 = vmatprep.mubr.msk.f32.mxu0 %vm5846_vm8, %v5844_v49 }
 0x59e   :  { %5786 = vmatprep.subr.mxu0 %v5844_v49 }
 0x59f   :  { %5787 = vmatpush3.msra.mxu0 %v6808_v50 }
 0x5a0   :  { %5789 = vmatmul.mubr.f32.vlgmr.msra.gmra.mxu0 %v4442_v24  ;;  %5798 = vmatprep.subr.mxu0 %v5844_v49 }
 0x5a1   :  { %5799 = vmatpush3.msra.mxu0 %v4482_v33  ;;  %5802 = vmatprep.mubr.msk.f32.mxu0 %vm5846_vm8, %v5844_v49 }
 0x5a2   :  { %5800 = vmatprep.subr.mxu0 %v5844_v49 }
 0x5a3   :  { %5801 = vmatpush3.msra.mxu0 %v4489_v36 }
 0x5a4   :  { %5803 = vmatmul.mubr.f32.vlgmr.msra.gmra.mxu0 %v4441_v32 }
 0x654   :  { %v4528_v5 = vpop.f32.mrf.mxu1 }
 0x656   :  { %v5783_v43 = vpop.f32.mrf.mxu1 }
 0x658   :  { %v4679_v59 = vpop.f32.mrf.mxu1 }
 0x65a   :  { %v5797_v0 = vpop.f32.mrf.mxu1 }
 0x65c   :  { %v4447_v38 = vpop.f32.mrf.mxu0  ;;  %v4829_v44 = vpop.f32.mrf.mxu1 }
 0x65d   :  { %v4448_v33 = vadd.f32 %v4875_v17, %v4447_v38 }
 0x65e   :  { %v5776_v40 = vpop.f32.mrf.mxu0  ;;  %v5811_v45 = vpop.f32.mrf.mxu1 }
 0x65f   :  { %v4529_v46 = vadd.f32 %v4528_v5, %v4448_v33 }
 0x660   :  { %v4604_v53 = vpop.f32.mrf.mxu0 }
 0x661   :  { %v4605_v49 = vadd.f32 %v4604_v53, %v4529_v46 }
 0x662   :  { %v5790_v14 = vpop.f32.mrf.mxu0 }
 0x663   :  { %v4680_v50 = vadd.f32 %v4679_v59, %v4605_v49 }
 0x664   :  { %v4756_v36 = vpop.f32.mrf.mxu0 }
 0x665   :  { %v4757_v54 = vadd.f32 %v4756_v36, %v4680_v50 }
 0x666   :  { %v5804_v62 = vpop.f32.mrf.mxu0 }
 0x667   :  { %v4830_v47 = vadd.f32 %v4829_v44, %v4757_v54 }
 0x669   :  { %4833 = vst [vmem:[#allocation2] sm:$0x3] %v4830_v47 }
 0x66a   :  { %5833 = shalt.err (!%p5830_p4)
}
 0x66b   :  { %4843 = dma.vmem_to_hbm [thread:$0]  %s4841_s12, 32, %s6866_s4, [#allocation3]  }
 0x66c   :  { %5842 = dma.done.wait [#allocation3], 32  }
 0x66d   :  { %5843 = vsyncadd [#allocation3], 4294967264 }
 0x66e   :  { %4847 = vsyncpa [#allocation3], 1 }

</bundles_post_ra>
